<compile_context>
chip_gen: v7x
topology: tpu7x:2x2x1
jax: 0.10.0
libtpu: 0.0.40
codegen_flags: <defaults>
</compile_context>

<pallas_src>
import math
import functools

import jax
import jax.numpy as jnp
from jax.experimental import pallas as pl
from jax.experimental.pallas import tpu as pltpu


# --------------------------------------------------------------------------- #
# Fused multi-layer encoder kernel.
# grid = (batch_blocks, num_layers); grid step (bi, li) runs layer `li` on batch
# block `bi`.  The residual stream is carried in `x_scr` (f32 VMEM) across layers.
# --------------------------------------------------------------------------- #
def _encoder_stack_kernel(src_ref, pos_ref,
                          wq_ref, bq_ref, wk_ref, bk_ref, wv_ref, bv_ref,
                          woh_ref, bo_ref,
                          n1w_ref, n1b_ref,
                          w1_ref, b1_ref, w2_ref, b2_ref,
                          n2w_ref, n2b_ref,
                          out_ref,
                          x_scr,
                          *, nhead, mm_dtype):
    eps = 1e-5
    li = pl.program_id(1)
    bb, S, D = src_ref.shape
    M = bb * S
    hd = D // nhead

    # Layer 0: load this batch block's activation into the carry scratch.
    @pl.when(li == 0)
    def _():
        x_scr[...] = src_ref[...].reshape(M, D).astype(jnp.float32)

    x = x_scr[...]                                        # (M, D) residual stream, f32
    pos = pos_ref[...].reshape(M, D).astype(jnp.float32)
    xp = (x + pos).astype(mm_dtype)                       # with_pos_embed -> q, k input
    xv = x.astype(mm_dtype)                               # v input (no pos)

    # ---- fused in-projections over the whole batch block (batch folded into M).
    # NOTE: 1/sqrt(hd) is pre-folded into wq / bq by the wrapper.
    q = jnp.dot(xp, wq_ref[0], preferred_element_type=jnp.float32) + bq_ref[0]
    k = jnp.dot(xp, wk_ref[0], preferred_element_type=jnp.float32) + bk_ref[0]
    v = jnp.dot(xv, wv_ref[0], preferred_element_type=jnp.float32) + bv_ref[0]

    # ---- head-major stacks: (G, S, hd) with G = bb * nhead, g = b*nhead + h.
    def to_heads(t):
        parts = []
        for b in range(bb):
            rows = t[b * S:(b + 1) * S, :]
            for h in range(nhead):
                parts.append(rows[:, h * hd:(h + 1) * hd].reshape(1, S, hd))
        return jnp.concatenate(parts, axis=0)

    qh = to_heads(q).astype(mm_dtype)
    kh = to_heads(k).astype(mm_dtype)
    vh = to_heads(v).astype(mm_dtype)

    # ---- head-batched scaled-dot-product attention (softmax kept in f32).
    s = jnp.einsum('gqd,gkd->gqk', qh, kh, preferred_element_type=jnp.float32)
    s = s - jnp.max(s, axis=-1, keepdims=True)
    p = jnp.exp(s)
    p = p * pl.reciprocal(jnp.sum(p, axis=-1, keepdims=True), approx=True)
    o = jnp.einsum('gqk,gkd->gqd', p.astype(mm_dtype), vh,
                   preferred_element_type=jnp.float32)    # (G, S, hd)

    # ---- out-projection: per-head batched matmul, then reduce heads (no lane concat).
    contrib = jnp.einsum('gqd,gdn->gqn', o.astype(mm_dtype), woh_ref[0],
                         preferred_element_type=jnp.float32)      # (G, S, D)
    if bb == 1:
        attn = jnp.sum(contrib, axis=0)                            # (S, D) == (M, D)
    else:
        attn = jnp.sum(contrib.reshape(bb, nhead, S, D), axis=1).reshape(M, D)
    attn = attn + bo_ref[0]

    # ---- residual + LayerNorm1 (f32)
    x1 = x + attn
    mu = jnp.mean(x1, axis=-1, keepdims=True)
    var = jnp.mean((x1 - mu) ** 2, axis=-1, keepdims=True)
    x1 = (x1 - mu) * jax.lax.rsqrt(var + eps) * n1w_ref[0] + n1b_ref[0]

    # ---- FFN: Linear -> ReLU -> Linear
    h1 = jnp.dot(x1.astype(mm_dtype), w1_ref[0],
                 preferred_element_type=jnp.float32) + b1_ref[0]
    h1 = jnp.maximum(h1, 0.0)
    h2 = jnp.dot(h1.astype(mm_dtype), w2_ref[0],
                 preferred_element_type=jnp.float32) + b2_ref[0]

    # ---- residual + LayerNorm2 (f32)
    y = x1 + h2
    mu = jnp.mean(y, axis=-1, keepdims=True)
    var = jnp.mean((y - mu) ** 2, axis=-1, keepdims=True)
    y = (y - mu) * jax.lax.rsqrt(var + eps) * n2w_ref[0] + n2b_ref[0]

    x_scr[...] = y                                        # carry to the next layer

    @pl.when(li == pl.num_programs(1) - 1)
    def _():
        out_ref[...] = y.reshape(bb, S, D).astype(out_ref.dtype)


# --------------------------------------------------------------------------- #
# Wrapper: matches TransformerEncoder.forward(src, mask=None,
#          src_key_padding_mask=None, pos) with seq-first (S, B, D) tensors.
# --------------------------------------------------------------------------- #
def transformer_encoder(src_sbd, pos_sbd, layer_params, *, nhead,
                        mm_dtype=jnp.bfloat16):
    S, B, D = src_sbd.shape
    L = len(layer_params)
    assert D % nhead == 0
    hd = D // nhead
    dff = layer_params[0]["w1"].shape[1]
    f32 = jnp.float32

    # One transpose for the whole fused stack (instead of per layer).
    x = jnp.transpose(src_sbd, (1, 0, 2))     # (B, S, D)
    pe = jnp.transpose(pos_sbd, (1, 0, 2))

    # Up to two batch blocks on a "parallel" grid axis (keeps both v7x TensorCores
    # busy); the rest of the batch is folded into the matmul M dimension.
    n_blk = 2 if (B >= 2 and B % 2 == 0) else 1
    bb = B // n_blk
    G = bb * nhead

    scale = 1.0 / math.sqrt(hd)

    def stack(name, fn):
        return jnp.stack([fn(p[name]) for p in layer_params], axis=0)

    wq = stack("wq", lambda w: (w * scale).astype(mm_dtype))          # (L, D, D)
    bq = stack("bq", lambda b: (b * scale).astype(f32))               # (L, 1, D)
    wk = stack("wk", lambda w: w.astype(mm_dtype))
    bk = stack("bk", lambda b: b.astype(f32))
    wv = stack("wv", lambda w: w.astype(mm_dtype))
    bv = stack("bv", lambda b: b.astype(f32))
    # Out-projection reshaped head-major (nhead, hd, D) and tiled to (G, hd, D).
    woh = stack("wo", lambda w: jnp.tile(
        w.reshape(nhead, hd, D).astype(mm_dtype), (bb, 1, 1)))        # (L, G, hd, D)
    bo = stack("bo", lambda b: b.astype(f32))
    n1w = stack("n1w", lambda b: b.astype(f32))
    n1b = stack("n1b", lambda b: b.astype(f32))
    w1 = stack("w1", lambda w: w.astype(mm_dtype))                    # (L, D, dff)
    b1 = stack("b1", lambda b: b.astype(f32))                         # (L, 1, dff)
    w2 = stack("w2", lambda w: w.astype(mm_dtype))                    # (L, dff, D)
    b2 = stack("b2", lambda b: b.astype(f32))
    n2w = stack("n2w", lambda b: b.astype(f32))
    n2b = stack("n2b", lambda b: b.astype(f32))

    def per_layer(shape):
        nd = len(shape)
        return pl.BlockSpec((1,) + tuple(shape), lambda b, l: (l,) + (0,) * nd)

    def io_spec():
        return pl.BlockSpec((bb, S, D), lambda b, l: (b, 0, 0))

    in_specs = [
        io_spec(), io_spec(),
        per_layer((D, D)), per_layer((1, D)),      # wq, bq
        per_layer((D, D)), per_layer((1, D)),      # wk, bk
        per_layer((D, D)), per_layer((1, D)),      # wv, bv
        per_layer((G, hd, D)), per_layer((1, D)),  # woh, bo
        per_layer((1, D)), per_layer((1, D)),      # norm1 w, b
        per_layer((D, dff)), per_layer((1, dff)),  # linear1 w, b
        per_layer((dff, D)), per_layer((1, D)),    # linear2 w, b
        per_layer((1, D)), per_layer((1, D)),      # norm2 w, b
    ]

    kern = functools.partial(_encoder_stack_kernel, nhead=nhead, mm_dtype=mm_dtype)
    out = pl.pallas_call(
        kern,
        out_shape=jax.ShapeDtypeStruct((B, S, D), src_sbd.dtype),
        grid=(n_blk, L),
        in_specs=in_specs,
        out_specs=io_spec(),
        scratch_shapes=[pltpu.VMEM((bb * S, D), jnp.float32)],
        compiler_params=pltpu.CompilerParams(
            dimension_semantics=("parallel", "arbitrary")),
    )(x, pe, wq, bq, wk, bk, wv, bv, woh, bo,
      n1w, n1b, w1, b1, w2, b2, n2w, n2b)

    # norm=None in the default RelTR Transformer (normalize_before=False).
    return jnp.transpose(out, (1, 0, 2))       # back to (S, B, D)


# --------------------------------------------------------------------------- #
# Params (weights stored as (in_features, out_features)).
# NOTE: PyTorch's _get_clones deep-copies the layer (identical params at init);
# this layout supports distinct per-layer params as needed for trained weights.
# Real nn.Linear / in_proj weights are (out, in) and must be transposed on load.
# --------------------------------------------------------------------------- #
def init_params(key, d_model, dim_feedforward, num_layers):
    D, F = d_model, dim_feedforward
    s = 0.05
    layers = []
    for i in range(num_layers):
        ks = jax.random.split(jax.random.fold_in(key, i), 6)
        layers.append({
            "wq": s * jax.random.normal(ks[0], (D, D), jnp.float32),
            "bq": jnp.zeros((1, D), jnp.float32),
            "wk": s * jax.random.normal(ks[1], (D, D), jnp.float32),
            "bk": jnp.zeros((1, D), jnp.float32),
            "wv": s * jax.random.normal(ks[2], (D, D), jnp.float32),
            "bv": jnp.zeros((1, D), jnp.float32),
            "wo": s * jax.random.normal(ks[3], (D, D), jnp.float32),
            "bo": jnp.zeros((1, D), jnp.float32),
            "n1w": jnp.ones((1, D), jnp.float32),
            "n1b": jnp.zeros((1, D), jnp.float32),
            "w1": s * jax.random.normal(ks[4], (D, F), jnp.float32),
            "b1": jnp.zeros((1, F), jnp.float32),
            "w2": s * jax.random.normal(ks[5], (F, D), jnp.float32),
            "b2": jnp.zeros((1, D), jnp.float32),
            "n2w": jnp.ones((1, D), jnp.float32),
            "n2b": jnp.zeros((1, D), jnp.float32),
        })
    return layers


# --------------------------------------------------------------------------- #
# Pure-JAX f32 reference (mirrors the PyTorch post-norm encoder layer, eval mode).
# --------------------------------------------------------------------------- #
def _layer_norm(x, w, b, eps=1e-5):
    mu = jnp.mean(x, axis=-1, keepdims=True)
    var = jnp.mean((x - mu) ** 2, axis=-1, keepdims=True)
    return (x - mu) * jax.lax.rsqrt(var + eps) * w + b


def reference_encoder(src_sbd, pos_sbd, layer_params, *, nhead):
    x = src_sbd.astype(jnp.float32)
    pos = pos_sbd.astype(jnp.float32)
    S, B, D = x.shape
    hd = D // nhead
    for p in layer_params:
        qk_in = x + pos
        q = qk_in @ p["wq"] + p["bq"][0]
        k = qk_in @ p["wk"] + p["bk"][0]
        v = x @ p["wv"] + p["bv"][0]
        qh = q.reshape(S, B, nhead, hd)
        kh = k.reshape(S, B, nhead, hd)
        vh = v.reshape(S, B, nhead, hd)
        s = jnp.einsum("qbhd,kbhd->bhqk", qh, kh) / math.sqrt(hd)
        a = jax.nn.softmax(s, axis=-1)
        o = jnp.einsum("bhqk,kbhd->qbhd", a, vh).reshape(S, B, D)
        attn = o @ p["wo"] + p["bo"][0]
        x = _layer_norm(x + attn, p["n1w"][0], p["n1b"][0])
        h = jax.nn.relu(x @ p["w1"] + p["b1"][0])
        h = h @ p["w2"] + p["b2"][0]
        x = _layer_norm(x + h, p["n2w"][0], p["n2b"][0])
    return x


if __name__ == "__main__":
    # Small shapes consistent with the module; d_model=128 keeps the lane dim dense.
    S, B, D = 16, 2, 128
    NHEAD, DFF, NUM_LAYERS = 8, 256, 2

    key = jax.random.PRNGKey(0)
    k_src, k_pos, k_par = jax.random.split(key, 3)
    src = jax.random.normal(k_src, (S, B, D), jnp.float32)
    pos = jax.random.normal(k_pos, (S, B, D), jnp.float32)
    layer_params = init_params(k_par, D, DFF, NUM_LAYERS)

    out = transformer_encoder(src, pos, layer_params, nhead=NHEAD)
    out = jax.block_until_ready(out)
    assert out.shape == (S, B, D)

    ref = reference_encoder(src, pos, layer_params, nhead=NHEAD)
    err = float(jnp.max(jnp.abs(out.astype(jnp.float32) - ref)))
    assert err < 0.25, f"kernel/reference mismatch: max abs err = {err}"
    print("KERNEL_OK")
</pallas_src>

<mosaic_0001>
module attributes {stable_mosaic.version = 11 : i64} {
  func.func @_encoder_stack_kernel(%arg0: i32, %arg1: i32, %arg2: memref<1x16x128xf32, #tpu.memory_space<vmem>>, %arg3: memref<1x16x128xf32, #tpu.memory_space<vmem>>, %arg4: memref<1x128x128xbf16, #tpu.memory_space<vmem>>, %arg5: memref<1x1x128xf32, #tpu.memory_space<vmem>>, %arg6: memref<1x128x128xbf16, #tpu.memory_space<vmem>>, %arg7: memref<1x1x128xf32, #tpu.memory_space<vmem>>, %arg8: memref<1x128x128xbf16, #tpu.memory_space<vmem>>, %arg9: memref<1x1x128xf32, #tpu.memory_space<vmem>>, %arg10: memref<1x8x16x128xbf16, #tpu.memory_space<vmem>>, %arg11: memref<1x1x128xf32, #tpu.memory_space<vmem>>, %arg12: memref<1x1x128xf32, #tpu.memory_space<vmem>>, %arg13: memref<1x1x128xf32, #tpu.memory_space<vmem>>, %arg14: memref<1x128x256xbf16, #tpu.memory_space<vmem>>, %arg15: memref<1x1x256xf32, #tpu.memory_space<vmem>>, %arg16: memref<1x256x128xbf16, #tpu.memory_space<vmem>>, %arg17: memref<1x1x128xf32, #tpu.memory_space<vmem>>, %arg18: memref<1x1x128xf32, #tpu.memory_space<vmem>>, %arg19: memref<1x1x128xf32, #tpu.memory_space<vmem>>, %arg20: memref<1x16x128xf32, #tpu.memory_space<vmem>>, %arg21: memref<16x128xf32, #tpu.memory_space<vmem>>) attributes {dimension_semantics = [#tpu.dimension_semantics<parallel>, #tpu.dimension_semantics<arbitrary>], iteration_bounds = array<i64: 2, 2>, scalar_prefetch = 0 : i64, scratch_operands = 1 : i64, tpu.core_type = #tpu.core_type<tc>, window_params = [{transform_indices = @transform_0, window_bounds = array<i64: 1, 16, 128>}, {transform_indices = @transform_1, window_bounds = array<i64: 1, 16, 128>}, {transform_indices = @transform_2, window_bounds = array<i64: 1, 128, 128>}, {transform_indices = @transform_3, window_bounds = array<i64: 1, 1, 128>}, {transform_indices = @transform_4, window_bounds = array<i64: 1, 128, 128>}, {transform_indices = @transform_5, window_bounds = array<i64: 1, 1, 128>}, {transform_indices = @transform_6, window_bounds = array<i64: 1, 128, 128>}, {transform_indices = @transform_7, window_bounds = array<i64: 1, 1, 128>}, {transform_indices = @transform_8, window_bounds = array<i64: 1, 8, 16, 128>}, {transform_indices = @transform_9, window_bounds = array<i64: 1, 1, 128>}, {transform_indices = @transform_10, window_bounds = array<i64: 1, 1, 128>}, {transform_indices = @transform_11, window_bounds = array<i64: 1, 1, 128>}, {transform_indices = @transform_12, window_bounds = array<i64: 1, 128, 256>}, {transform_indices = @transform_13, window_bounds = array<i64: 1, 1, 256>}, {transform_indices = @transform_14, window_bounds = array<i64: 1, 256, 128>}, {transform_indices = @transform_15, window_bounds = array<i64: 1, 1, 128>}, {transform_indices = @transform_16, window_bounds = array<i64: 1, 1, 128>}, {transform_indices = @transform_17, window_bounds = array<i64: 1, 1, 128>}, {transform_indices = @transform_18, window_bounds = array<i64: 1, 16, 128>}]} {
    %c0_i32 = arith.constant 0 : i32
    %0 = arith.cmpi eq, %arg1, %c0_i32 : i32
    %1 = arith.extui %0 : i1 to i32
    %c0_i32_0 = arith.constant 0 : i32
    %2 = arith.cmpi ne, %1, %c0_i32_0 : i32
    scf.if %2 {
      %c0_78 = arith.constant 0 : index
      %c0_79 = arith.constant 0 : index
      %c0_80 = arith.constant 0 : index
      %182 = vector.load %arg2[%c0_78, %c0_79, %c0_80] : memref<1x16x128xf32, #tpu.memory_space<vmem>>, vector<1x16x128xf32>
      %183 = vector.shape_cast %182 : vector<1x16x128xf32> to vector<16x128xf32>
      %c0_81 = arith.constant 0 : index
      %c0_82 = arith.constant 0 : index
      %184 = vector.load %arg21[%c0_81, %c0_82] : memref<16x128xf32, #tpu.memory_space<vmem>>, vector<16x128xf32>
      tpu.vector_store %arg21[%c0_81, %c0_82], %183 {strides = array<i32>} : memref<16x128xf32, #tpu.memory_space<vmem>>, vector<16x128xf32>,
    } else {
    }
    %c0 = arith.constant 0 : index
    %c0_1 = arith.constant 0 : index
    %3 = vector.load %arg21[%c0, %c0_1] : memref<16x128xf32, #tpu.memory_space<vmem>>, vector<16x128xf32>
    %c0_2 = arith.constant 0 : index
    %c0_3 = arith.constant 0 : index
    %c0_4 = arith.constant 0 : index
    %4 = vector.load %arg3[%c0_2, %c0_3, %c0_4] : memref<1x16x128xf32, #tpu.memory_space<vmem>>, vector<1x16x128xf32>
    %5 = vector.shape_cast %4 : vector<1x16x128xf32> to vector<16x128xf32>
    %6 = arith.addf %3, %5 : vector<16x128xf32>
    %7 = arith.truncf %6 : vector<16x128xf32> to vector<16x128xbf16>
    %8 = arith.truncf %3 : vector<16x128xf32> to vector<16x128xbf16>
    %c0_5 = arith.constant 0 : index
    %c0_6 = arith.constant 0 : index
    %c0_7 = arith.constant 0 : index
    %9 = vector.load %arg4[%c0_5, %c0_6, %c0_7] : memref<1x128x128xbf16, #tpu.memory_space<vmem>>, vector<1x128x128xbf16>
    %10 = vector.shape_cast %9 : vector<1x128x128xbf16> to vector<128x128xbf16>
    %cst = arith.constant dense<0.000000e+00> : vector<16x128xf32>
    %11 = tpu.matmul %7, %10, %cst {dimension_numbers = #tpu.dot_dimension_numbers<[1], [0], [0], [1], [0, 0, 1, 1], [], []>} : vector<16x128xbf16>, vector<128x128xbf16>, vector<16x128xf32> -> vector<16x128xf32>
    %c0_8 = arith.constant 0 : index
    %c0_9 = arith.constant 0 : index
    %c0_10 = arith.constant 0 : index
    %12 = vector.load %arg5[%c0_8, %c0_9, %c0_10] : memref<1x1x128xf32, #tpu.memory_space<vmem>>, vector<1x1x128xf32>
    %13 = vector.shape_cast %12 : vector<1x1x128xf32> to vector<1x128xf32>
    %14 = vector.broadcast %13 : vector<1x128xf32> to vector<16x128xf32>
    %15 = arith.addf %11, %14 : vector<16x128xf32>
    %c0_11 = arith.constant 0 : index
    %c0_12 = arith.constant 0 : index
    %c0_13 = arith.constant 0 : index
    %16 = vector.load %arg6[%c0_11, %c0_12, %c0_13] : memref<1x128x128xbf16, #tpu.memory_space<vmem>>, vector<1x128x128xbf16>
    %17 = vector.shape_cast %16 : vector<1x128x128xbf16> to vector<128x128xbf16>
    %cst_14 = arith.constant dense<0.000000e+00> : vector<16x128xf32>
    %18 = tpu.matmul %7, %17, %cst_14 {dimension_numbers = #tpu.dot_dimension_numbers<[1], [0], [0], [1], [0, 0, 1, 1], [], []>} : vector<16x128xbf16>, vector<128x128xbf16>, vector<16x128xf32> -> vector<16x128xf32>
    %c0_15 = arith.constant 0 : index
    %c0_16 = arith.constant 0 : index
    %c0_17 = arith.constant 0 : index
    %19 = vector.load %arg7[%c0_15, %c0_16, %c0_17] : memref<1x1x128xf32, #tpu.memory_space<vmem>>, vector<1x1x128xf32>
    %20 = vector.shape_cast %19 : vector<1x1x128xf32> to vector<1x128xf32>
    %21 = vector.broadcast %20 : vector<1x128xf32> to vector<16x128xf32>
    %22 = arith.addf %18, %21 : vector<16x128xf32>
    %c0_18 = arith.constant 0 : index
    %c0_19 = arith.constant 0 : index
    %c0_20 = arith.constant 0 : index
    %23 = vector.load %arg8[%c0_18, %c0_19, %c0_20] : memref<1x128x128xbf16, #tpu.memory_space<vmem>>, vector<1x128x128xbf16>
    %24 = vector.shape_cast %23 : vector<1x128x128xbf16> to vector<128x128xbf16>
    %cst_21 = arith.constant dense<0.000000e+00> : vector<16x128xf32>
    %25 = tpu.matmul %8, %24, %cst_21 {dimension_numbers = #tpu.dot_dimension_numbers<[1], [0], [0], [1], [0, 0, 1, 1], [], []>} : vector<16x128xbf16>, vector<128x128xbf16>, vector<16x128xf32> -> vector<16x128xf32>
    %c0_22 = arith.constant 0 : index
    %c0_23 = arith.constant 0 : index
    %c0_24 = arith.constant 0 : index
    %26 = vector.load %arg9[%c0_22, %c0_23, %c0_24] : memref<1x1x128xf32, #tpu.memory_space<vmem>>, vector<1x1x128xf32>
    %27 = vector.shape_cast %26 : vector<1x1x128xf32> to vector<1x128xf32>
    %28 = vector.broadcast %27 : vector<1x128xf32> to vector<16x128xf32>
    %29 = arith.addf %25, %28 : vector<16x128xf32>
    %30 = vector.extract_strided_slice %15 {offsets = [0, 0], sizes = [16, 16], strides = [1, 1]} : vector<16x128xf32> to vector<16x16xf32>
    %31 = vector.shape_cast %30 : vector<16x16xf32> to vector<1x16x16xf32>
    %32 = vector.extract_strided_slice %15 {offsets = [0, 16], sizes = [16, 16], strides = [1, 1]} : vector<16x128xf32> to vector<16x16xf32>
    %33 = vector.shape_cast %32 : vector<16x16xf32> to vector<1x16x16xf32>
    %34 = vector.extract_strided_slice %15 {offsets = [0, 32], sizes = [16, 16], strides = [1, 1]} : vector<16x128xf32> to vector<16x16xf32>
    %35 = vector.shape_cast %34 : vector<16x16xf32> to vector<1x16x16xf32>
    %36 = vector.extract_strided_slice %15 {offsets = [0, 48], sizes = [16, 16], strides = [1, 1]} : vector<16x128xf32> to vector<16x16xf32>
    %37 = vector.shape_cast %36 : vector<16x16xf32> to vector<1x16x16xf32>
    %38 = vector.extract_strided_slice %15 {offsets = [0, 64], sizes = [16, 16], strides = [1, 1]} : vector<16x128xf32> to vector<16x16xf32>
    %39 = vector.shape_cast %38 : vector<16x16xf32> to vector<1x16x16xf32>
    %40 = vector.extract_strided_slice %15 {offsets = [0, 80], sizes = [16, 16], strides = [1, 1]} : vector<16x128xf32> to vector<16x16xf32>
    %41 = vector.shape_cast %40 : vector<16x16xf32> to vector<1x16x16xf32>
    %42 = vector.extract_strided_slice %15 {offsets = [0, 96], sizes = [16, 16], strides = [1, 1]} : vector<16x128xf32> to vector<16x16xf32>
    %43 = vector.shape_cast %42 : vector<16x16xf32> to vector<1x16x16xf32>
    %44 = vector.extract_strided_slice %15 {offsets = [0, 112], sizes = [16, 16], strides = [1, 1]} : vector<16x128xf32> to vector<16x16xf32>
    %45 = vector.shape_cast %44 : vector<16x16xf32> to vector<1x16x16xf32>
    %46 = tpu.concatenate %31, %33, %35, %37, %39, %41, %43, %45 in 0 : vector<1x16x16xf32>, vector<1x16x16xf32>, vector<1x16x16xf32>, vector<1x16x16xf32>, vector<1x16x16xf32>, vector<1x16x16xf32>, vector<1x16x16xf32>, vector<1x16x16xf32> -> vector<8x16x16xf32>
    %47 = arith.truncf %46 : vector<8x16x16xf32> to vector<8x16x16xbf16>
    %48 = vector.extract_strided_slice %22 {offsets = [0, 0], sizes = [16, 16], strides = [1, 1]} : vector<16x128xf32> to vector<16x16xf32>
    %49 = vector.shape_cast %48 : vector<16x16xf32> to vector<1x16x16xf32>
    %50 = vector.extract_strided_slice %22 {offsets = [0, 16], sizes = [16, 16], strides = [1, 1]} : vector<16x128xf32> to vector<16x16xf32>
    %51 = vector.shape_cast %50 : vector<16x16xf32> to vector<1x16x16xf32>
    %52 = vector.extract_strided_slice %22 {offsets = [0, 32], sizes = [16, 16], strides = [1, 1]} : vector<16x128xf32> to vector<16x16xf32>
    %53 = vector.shape_cast %52 : vector<16x16xf32> to vector<1x16x16xf32>
    %54 = vector.extract_strided_slice %22 {offsets = [0, 48], sizes = [16, 16], strides = [1, 1]} : vector<16x128xf32> to vector<16x16xf32>
    %55 = vector.shape_cast %54 : vector<16x16xf32> to vector<1x16x16xf32>
    %56 = vector.extract_strided_slice %22 {offsets = [0, 64], sizes = [16, 16], strides = [1, 1]} : vector<16x128xf32> to vector<16x16xf32>
    %57 = vector.shape_cast %56 : vector<16x16xf32> to vector<1x16x16xf32>
    %58 = vector.extract_strided_slice %22 {offsets = [0, 80], sizes = [16, 16], strides = [1, 1]} : vector<16x128xf32> to vector<16x16xf32>
    %59 = vector.shape_cast %58 : vector<16x16xf32> to vector<1x16x16xf32>
    %60 = vector.extract_strided_slice %22 {offsets = [0, 96], sizes = [16, 16], strides = [1, 1]} : vector<16x128xf32> to vector<16x16xf32>
    %61 = vector.shape_cast %60 : vector<16x16xf32> to vector<1x16x16xf32>
    %62 = vector.extract_strided_slice %22 {offsets = [0, 112], sizes = [16, 16], strides = [1, 1]} : vector<16x128xf32> to vector<16x16xf32>
    %63 = vector.shape_cast %62 : vector<16x16xf32> to vector<1x16x16xf32>
    %64 = tpu.concatenate %49, %51, %53, %55, %57, %59, %61, %63 in 0 : vector<1x16x16xf32>, vector<1x16x16xf32>, vector<1x16x16xf32>, vector<1x16x16xf32>, vector<1x16x16xf32>, vector<1x16x16xf32>, vector<1x16x16xf32>, vector<1x16x16xf32> -> vector<8x16x16xf32>
    %65 = arith.truncf %64 : vector<8x16x16xf32> to vector<8x16x16xbf16>
    %66 = vector.extract_strided_slice %29 {offsets = [0, 0], sizes = [16, 16], strides = [1, 1]} : vector<16x128xf32> to vector<16x16xf32>
    %67 = vector.shape_cast %66 : vector<16x16xf32> to vector<1x16x16xf32>
    %68 = vector.extract_strided_slice %29 {offsets = [0, 16], sizes = [16, 16], strides = [1, 1]} : vector<16x128xf32> to vector<16x16xf32>
    %69 = vector.shape_cast %68 : vector<16x16xf32> to vector<1x16x16xf32>
    %70 = vector.extract_strided_slice %29 {offsets = [0, 32], sizes = [16, 16], strides = [1, 1]} : vector<16x128xf32> to vector<16x16xf32>
    %71 = vector.shape_cast %70 : vector<16x16xf32> to vector<1x16x16xf32>
    %72 = vector.extract_strided_slice %29 {offsets = [0, 48], sizes = [16, 16], strides = [1, 1]} : vector<16x128xf32> to vector<16x16xf32>
    %73 = vector.shape_cast %72 : vector<16x16xf32> to vector<1x16x16xf32>
    %74 = vector.extract_strided_slice %29 {offsets = [0, 64], sizes = [16, 16], strides = [1, 1]} : vector<16x128xf32> to vector<16x16xf32>
    %75 = vector.shape_cast %74 : vector<16x16xf32> to vector<1x16x16xf32>
    %76 = vector.extract_strided_slice %29 {offsets = [0, 80], sizes = [16, 16], strides = [1, 1]} : vector<16x128xf32> to vector<16x16xf32>
    %77 = vector.shape_cast %76 : vector<16x16xf32> to vector<1x16x16xf32>
    %78 = vector.extract_strided_slice %29 {offsets = [0, 96], sizes = [16, 16], strides = [1, 1]} : vector<16x128xf32> to vector<16x16xf32>
    %79 = vector.shape_cast %78 : vector<16x16xf32> to vector<1x16x16xf32>
    %80 = vector.extract_strided_slice %29 {offsets = [0, 112], sizes = [16, 16], strides = [1, 1]} : vector<16x128xf32> to vector<16x16xf32>
    %81 = vector.shape_cast %80 : vector<16x16xf32> to vector<1x16x16xf32>
    %82 = tpu.concatenate %67, %69, %71, %73, %75, %77, %79, %81 in 0 : vector<1x16x16xf32>, vector<1x16x16xf32>, vector<1x16x16xf32>, vector<1x16x16xf32>, vector<1x16x16xf32>, vector<1x16x16xf32>, vector<1x16x16xf32>, vector<1x16x16xf32> -> vector<8x16x16xf32>
    %83 = arith.truncf %82 : vector<8x16x16xf32> to vector<8x16x16xbf16>
    "tpu.trace_start"() <{level = 10 : i32, message = "gqd,gkd->gqk"}> : () -> ()
    %cst_25 = arith.constant dense<0.000000e+00> : vector<8x16x16xf32>
    %84 = tpu.matmul %47, %65, %cst_25 {dimension_numbers = #tpu.dot_dimension_numbers<[2], [2], [1], [1], [0, 0, 0, 1, 1, 1], [0], [0]>} : vector<8x16x16xbf16>, vector<8x16x16xbf16>, vector<8x16x16xf32> -> vector<8x16x16xf32>
    "tpu.trace_stop"() : () -> ()
    %cst_26 = arith.constant dense<0xFF800000> : vector<8x16xf32>
    %85 = vector.multi_reduction <maximumf>, %84, %cst_26 [2] : vector<8x16x16xf32> to vector<8x16xf32>
    %86 = vector.shape_cast %85 : vector<8x16xf32> to vector<8x16x1xf32>
    %87 = vector.broadcast %86 : vector<8x16x1xf32> to vector<8x16x16xf32>
    %88 = arith.subf %84, %87 : vector<8x16x16xf32>
    %89 = math.exp %88 : vector<8x16x16xf32>
    %cst_27 = arith.constant dense<0.000000e+00> : vector<8x16xf32>
    %90 = vector.multi_reduction <add>, %89, %cst_27 [2] : vector<8x16x16xf32> to vector<8x16xf32>
    %91 = vector.shape_cast %90 : vector<8x16xf32> to vector<8x16x1xf32>
    %92 = tpu.reciprocal %91 {approx = true} : vector<8x16x1xf32> -> vector<8x16x1xf32>
    %93 = vector.broadcast %92 : vector<8x16x1xf32> to vector<8x16x16xf32>
    %94 = arith.mulf %89, %93 : vector<8x16x16xf32>
    %95 = arith.truncf %94 : vector<8x16x16xf32> to vector<8x16x16xbf16>
    "tpu.trace_start"() <{level = 10 : i32, message = "gqk,gkd->gqd"}> : () -> ()
    %cst_28 = arith.constant dense<0.000000e+00> : vector<8x16x16xf32>
    %96 = tpu.matmul %95, %83, %cst_28 {dimension_numbers = #tpu.dot_dimension_numbers<[2], [1], [1], [2], [0, 0, 0, 1, 1, 2], [0], [0]>} : vector<8x16x16xbf16>, vector<8x16x16xbf16>, vector<8x16x16xf32> -> vector<8x16x16xf32>
    "tpu.trace_stop"() : () -> ()
    %97 = arith.truncf %96 : vector<8x16x16xf32> to vector<8x16x16xbf16>
    %c0_29 = arith.constant 0 : index
    %c0_30 = arith.constant 0 : index
    %c0_31 = arith.constant 0 : index
    %c0_32 = arith.constant 0 : index
    %98 = vector.load %arg10[%c0_29, %c0_30, %c0_31, %c0_32] : memref<1x8x16x128xbf16, #tpu.memory_space<vmem>>, vector<1x8x16x128xbf16>
    %99 = vector.shape_cast %98 : vector<1x8x16x128xbf16> to vector<8x16x128xbf16>
    "tpu.trace_start"() <{level = 10 : i32, message = "gqd,gdn->gqn"}> : () -> ()
    %cst_33 = arith.constant dense<0.000000e+00> : vector<8x16x128xf32>
    %100 = tpu.matmul %97, %99, %cst_33 {dimension_numbers = #tpu.dot_dimension_numbers<[2], [1], [1], [2], [0, 0, 0, 1, 1, 2], [0], [0]>} : vector<8x16x16xbf16>, vector<8x16x128xbf16>, vector<8x16x128xf32> -> vector<8x16x128xf32>
    "tpu.trace_stop"() : () -> ()
    %cst_34 = arith.constant dense<0.000000e+00> : vector<16x128xf32>
    %101 = vector.multi_reduction <add>, %100, %cst_34 [0] : vector<8x16x128xf32> to vector<16x128xf32>
    %c0_35 = arith.constant 0 : index
    %c0_36 = arith.constant 0 : index
    %c0_37 = arith.constant 0 : index
    %102 = vector.load %arg11[%c0_35, %c0_36, %c0_37] : memref<1x1x128xf32, #tpu.memory_space<vmem>>, vector<1x1x128xf32>
    %103 = vector.shape_cast %102 : vector<1x1x128xf32> to vector<1x128xf32>
    %104 = vector.broadcast %103 : vector<1x128xf32> to vector<16x128xf32>
    %105 = arith.addf %101, %104 : vector<16x128xf32>
    %106 = arith.addf %3, %105 : vector<16x128xf32>
    %cst_38 = arith.constant dense<0.000000e+00> : vector<16xf32>
    %107 = vector.multi_reduction <add>, %106, %cst_38 [1] : vector<16x128xf32> to vector<16xf32>
    %108 = vector.shape_cast %107 : vector<16xf32> to vector<16x1xf32>
    %cst_39 = arith.constant 1.280000e+02 : f32
    %109 = vector.broadcast %cst_39 : f32 to vector<16x1xf32>
    %110 = arith.divf %108, %109 : vector<16x1xf32>
    %111 = vector.broadcast %110 : vector<16x1xf32> to vector<16x128xf32>
    %112 = arith.subf %106, %111 : vector<16x128xf32>
    %113 = arith.mulf %112, %112 : vector<16x128xf32>
    %cst_40 = arith.constant dense<0.000000e+00> : vector<16xf32>
    %114 = vector.multi_reduction <add>, %113, %cst_40 [1] : vector<16x128xf32> to vector<16xf32>
    %115 = vector.shape_cast %114 : vector<16xf32> to vector<16x1xf32>
    %cst_41 = arith.constant 1.280000e+02 : f32
    %116 = vector.broadcast %cst_41 : f32 to vector<16x1xf32>
    %117 = arith.divf %115, %116 : vector<16x1xf32>
    %118 = vector.broadcast %110 : vector<16x1xf32> to vector<16x128xf32>
    %119 = arith.subf %106, %118 : vector<16x128xf32>
    %cst_42 = arith.constant 9.99999974E-6 : f32
    %120 = vector.broadcast %cst_42 : f32 to vector<16x1xf32>
    %121 = arith.addf %117, %120 : vector<16x1xf32>
    %122 = math.rsqrt %121 : vector<16x1xf32>
    %123 = vector.broadcast %122 : vector<16x1xf32> to vector<16x128xf32>
    %124 = arith.mulf %119, %123 : vector<16x128xf32>
    %c0_43 = arith.constant 0 : index
    %c0_44 = arith.constant 0 : index
    %c0_45 = arith.constant 0 : index
    %125 = vector.load %arg12[%c0_43, %c0_44, %c0_45] : memref<1x1x128xf32, #tpu.memory_space<vmem>>, vector<1x1x128xf32>
    %126 = vector.shape_cast %125 : vector<1x1x128xf32> to vector<1x128xf32>
    %127 = vector.broadcast %126 : vector<1x128xf32> to vector<16x128xf32>
    %128 = arith.mulf %124, %127 : vector<16x128xf32>
    %c0_46 = arith.constant 0 : index
    %c0_47 = arith.constant 0 : index
    %c0_48 = arith.constant 0 : index
    %129 = vector.load %arg13[%c0_46, %c0_47, %c0_48] : memref<1x1x128xf32, #tpu.memory_space<vmem>>, vector<1x1x128xf32>
    %130 = vector.shape_cast %129 : vector<1x1x128xf32> to vector<1x128xf32>
    %131 = vector.broadcast %130 : vector<1x128xf32> to vector<16x128xf32>
    %132 = arith.addf %128, %131 : vector<16x128xf32>
    %133 = arith.truncf %132 : vector<16x128xf32> to vector<16x128xbf16>
    %c0_49 = arith.constant 0 : index
    %c0_50 = arith.constant 0 : index
    %c0_51 = arith.constant 0 : index
    %134 = vector.load %arg14[%c0_49, %c0_50, %c0_51] : memref<1x128x256xbf16, #tpu.memory_space<vmem>>, vector<1x128x256xbf16>
    %135 = vector.shape_cast %134 : vector<1x128x256xbf16> to vector<128x256xbf16>
    %cst_52 = arith.constant dense<0.000000e+00> : vector<16x256xf32>
    %136 = tpu.matmul %133, %135, %cst_52 {dimension_numbers = #tpu.dot_dimension_numbers<[1], [0], [0], [1], [0, 0, 1, 1], [], []>} : vector<16x128xbf16>, vector<128x256xbf16>, vector<16x256xf32> -> vector<16x256xf32>
    %c0_53 = arith.constant 0 : index
    %c0_54 = arith.constant 0 : index
    %c0_55 = arith.constant 0 : index
    %137 = vector.load %arg15[%c0_53, %c0_54, %c0_55] : memref<1x1x256xf32, #tpu.memory_space<vmem>>, vector<1x1x256xf32>
    %138 = vector.shape_cast %137 : vector<1x1x256xf32> to vector<1x256xf32>
    %139 = vector.broadcast %138 : vector<1x256xf32> to vector<16x256xf32>
    %140 = arith.addf %136, %139 : vector<16x256xf32>
    %cst_56 = arith.constant 0.000000e+00 : f32
    %141 = vector.broadcast %cst_56 : f32 to vector<16x256xf32>
    %142 = arith.maximumf %140, %141 : vector<16x256xf32>
    %143 = arith.truncf %142 : vector<16x256xf32> to vector<16x256xbf16>
    %c0_57 = arith.constant 0 : index
    %c0_58 = arith.constant 0 : index
    %c0_59 = arith.constant 0 : index
    %144 = vector.load %arg16[%c0_57, %c0_58, %c0_59] : memref<1x256x128xbf16, #tpu.memory_space<vmem>>, vector<1x256x128xbf16>
    %145 = vector.shape_cast %144 : vector<1x256x128xbf16> to vector<256x128xbf16>
    %cst_60 = arith.constant dense<0.000000e+00> : vector<16x128xf32>
    %146 = tpu.matmul %143, %145, %cst_60 {dimension_numbers = #tpu.dot_dimension_numbers<[1], [0], [0], [1], [0, 0, 1, 1], [], []>} : vector<16x256xbf16>, vector<256x128xbf16>, vector<16x128xf32> -> vector<16x128xf32>
    %c0_61 = arith.constant 0 : index
    %c0_62 = arith.constant 0 : index
    %c0_63 = arith.constant 0 : index
    %147 = vector.load %arg17[%c0_61, %c0_62, %c0_63] : memref<1x1x128xf32, #tpu.memory_space<vmem>>, vector<1x1x128xf32>
    %148 = vector.shape_cast %147 : vector<1x1x128xf32> to vector<1x128xf32>
    %149 = vector.broadcast %148 : vector<1x128xf32> to vector<16x128xf32>
    %150 = arith.addf %146, %149 : vector<16x128xf32>
    %151 = arith.addf %132, %150 : vector<16x128xf32>
    %cst_64 = arith.constant dense<0.000000e+00> : vector<16xf32>
    %152 = vector.multi_reduction <add>, %151, %cst_64 [1] : vector<16x128xf32> to vector<16xf32>
    %153 = vector.shape_cast %152 : vector<16xf32> to vector<16x1xf32>
    %cst_65 = arith.constant 1.280000e+02 : f32
    %154 = vector.broadcast %cst_65 : f32 to vector<16x1xf32>
    %155 = arith.divf %153, %154 : vector<16x1xf32>
    %156 = vector.broadcast %155 : vector<16x1xf32> to vector<16x128xf32>
    %157 = arith.subf %151, %156 : vector<16x128xf32>
    %158 = arith.mulf %157, %157 : vector<16x128xf32>
    %cst_66 = arith.constant dense<0.000000e+00> : vector<16xf32>
    %159 = vector.multi_reduction <add>, %158, %cst_66 [1] : vector<16x128xf32> to vector<16xf32>
    %160 = vector.shape_cast %159 : vector<16xf32> to vector<16x1xf32>
    %cst_67 = arith.constant 1.280000e+02 : f32
    %161 = vector.broadcast %cst_67 : f32 to vector<16x1xf32>
    %162 = arith.divf %160, %161 : vector<16x1xf32>
    %163 = vector.broadcast %155 : vector<16x1xf32> to vector<16x128xf32>
    %164 = arith.subf %151, %163 : vector<16x128xf32>
    %cst_68 = arith.constant 9.99999974E-6 : f32
    %165 = vector.broadcast %cst_68 : f32 to vector<16x1xf32>
    %166 = arith.addf %162, %165 : vector<16x1xf32>
    %167 = math.rsqrt %166 : vector<16x1xf32>
    %168 = vector.broadcast %167 : vector<16x1xf32> to vector<16x128xf32>
    %169 = arith.mulf %164, %168 : vector<16x128xf32>
    %c0_69 = arith.constant 0 : index
    %c0_70 = arith.constant 0 : index
    %c0_71 = arith.constant 0 : index
    %170 = vector.load %arg18[%c0_69, %c0_70, %c0_71] : memref<1x1x128xf32, #tpu.memory_space<vmem>>, vector<1x1x128xf32>
    %171 = vector.shape_cast %170 : vector<1x1x128xf32> to vector<1x128xf32>
    %172 = vector.broadcast %171 : vector<1x128xf32> to vector<16x128xf32>
    %173 = arith.mulf %169, %172 : vector<16x128xf32>
    %c0_72 = arith.constant 0 : index
    %c0_73 = arith.constant 0 : index
    %c0_74 = arith.constant 0 : index
    %174 = vector.load %arg19[%c0_72, %c0_73, %c0_74] : memref<1x1x128xf32, #tpu.memory_space<vmem>>, vector<1x1x128xf32>
    %175 = vector.shape_cast %174 : vector<1x1x128xf32> to vector<1x128xf32>
    %176 = vector.broadcast %175 : vector<1x128xf32> to vector<16x128xf32>
    %177 = arith.addf %173, %176 : vector<16x128xf32>
    %c0_75 = arith.constant 0 : index
    %c0_76 = arith.constant 0 : index
    %178 = vector.load %arg21[%c0_75, %c0_76] : memref<16x128xf32, #tpu.memory_space<vmem>>, vector<16x128xf32>
    tpu.vector_store %arg21[%c0_75, %c0_76], %177 {strides = array<i32>} : memref<16x128xf32, #tpu.memory_space<vmem>>, vector<16x128xf32>,
    %c1_i32 = arith.constant 1 : i32
    %179 = arith.cmpi eq, %arg1, %c1_i32 : i32
    %180 = arith.extui %179 : i1 to i32
    %c0_i32_77 = arith.constant 0 : i32
    %181 = arith.cmpi ne, %180, %c0_i32_77 : i32
    scf.if %181 {
      %182 = vector.shape_cast %177 : vector<16x128xf32> to vector<1x16x128xf32>
      %c0_78 = arith.constant 0 : index
      %c0_79 = arith.constant 0 : index
      %c0_80 = arith.constant 0 : index
      %183 = vector.load %arg20[%c0_78, %c0_79, %c0_80] : memref<1x16x128xf32, #tpu.memory_space<vmem>>, vector<1x16x128xf32>
      tpu.vector_store %arg20[%c0_78, %c0_79, %c0_80], %182 {strides = array<i32>} : memref<1x16x128xf32, #tpu.memory_space<vmem>>, vector<1x16x128xf32>,
    } else {
    }
    return
  }
  func.func @transform_0(%arg0: i32, %arg1: i32) -> (i32, i32, i32) {
    %c0_i32 = arith.constant 0 : i32
    %c0_i32_0 = arith.constant 0 : i32
    %c0_i32_1 = arith.constant 0 : i32
    return %arg0, %c0_i32, %c0_i32_0 : i32, i32, i32
  }
  func.func @transform_1(%arg0: i32, %arg1: i32) -> (i32, i32, i32) {
    %c0_i32 = arith.constant 0 : i32
    %c0_i32_0 = arith.constant 0 : i32
    %c0_i32_1 = arith.constant 0 : i32
    return %arg0, %c0_i32, %c0_i32_0 : i32, i32, i32
  }
  func.func @transform_2(%arg0: i32, %arg1: i32) -> (i32, i32, i32) {
    %c0_i32 = arith.constant 0 : i32
    %c0_i32_0 = arith.constant 0 : i32
    %c0_i32_1 = arith.constant 0 : i32
    return %arg1, %c0_i32, %c0_i32_0 : i32, i32, i32
  }
  func.func @transform_3(%arg0: i32, %arg1: i32) -> (i32, i32, i32) {
    %c0_i32 = arith.constant 0 : i32
    %c0_i32_0 = arith.constant 0 : i32
    %c0_i32_1 = arith.constant 0 : i32
    return %arg1, %c0_i32, %c0_i32_0 : i32, i32, i32
  }
  func.func @transform_4(%arg0: i32, %arg1: i32) -> (i32, i32, i32) {
    %c0_i32 = arith.constant 0 : i32
    %c0_i32_0 = arith.constant 0 : i32
    %c0_i32_1 = arith.constant 0 : i32
    return %arg1, %c0_i32, %c0_i32_0 : i32, i32, i32
  }
  func.func @transform_5(%arg0: i32, %arg1: i32) -> (i32, i32, i32) {
    %c0_i32 = arith.constant 0 : i32
    %c0_i32_0 = arith.constant 0 : i32
    %c0_i32_1 = arith.constant 0 : i32
    return %arg1, %c0_i32, %c0_i32_0 : i32, i32, i32
  }
  func.func @transform_6(%arg0: i32, %arg1: i32) -> (i32, i32, i32) {
    %c0_i32 = arith.constant 0 : i32
    %c0_i32_0 = arith.constant 0 : i32
    %c0_i32_1 = arith.constant 0 : i32
    return %arg1, %c0_i32, %c0_i32_0 : i32, i32, i32
  }
  func.func @transform_7(%arg0: i32, %arg1: i32) -> (i32, i32, i32) {
    %c0_i32 = arith.constant 0 : i32
    %c0_i32_0 = arith.constant 0 : i32
    %c0_i32_1 = arith.constant 0 : i32
    return %arg1, %c0_i32, %c0_i32_0 : i32, i32, i32
  }
  func.func @transform_8(%arg0: i32, %arg1: i32) -> (i32, i32, i32, i32) {
    %c0_i32 = arith.constant 0 : i32
    %c0_i32_0 = arith.constant 0 : i32
    %c0_i32_1 = arith.constant 0 : i32
    %c0_i32_2 = arith.constant 0 : i32
    return %arg1, %c0_i32, %c0_i32_0, %c0_i32_1 : i32, i32, i32, i32
  }
  func.func @transform_9(%arg0: i32, %arg1: i32) -> (i32, i32, i32) {
    %c0_i32 = arith.constant 0 : i32
    %c0_i32_0 = arith.constant 0 : i32
    %c0_i32_1 = arith.constant 0 : i32
    return %arg1, %c0_i32, %c0_i32_0 : i32, i32, i32
  }
  func.func @transform_10(%arg0: i32, %arg1: i32) -> (i32, i32, i32) {
    %c0_i32 = arith.constant 0 : i32
    %c0_i32_0 = arith.constant 0 : i32
    %c0_i32_1 = arith.constant 0 : i32
    return %arg1, %c0_i32, %c0_i32_0 : i32, i32, i32
  }
  func.func @transform_11(%arg0: i32, %arg1: i32) -> (i32, i32, i32) {
    %c0_i32 = arith.constant 0 : i32
    %c0_i32_0 = arith.constant 0 : i32
    %c0_i32_1 = arith.constant 0 : i32
    return %arg1, %c0_i32, %c0_i32_0 : i32, i32, i32
  }
  func.func @transform_12(%arg0: i32, %arg1: i32) -> (i32, i32, i32) {
    %c0_i32 = arith.constant 0 : i32
    %c0_i32_0 = arith.constant 0 : i32
    %c0_i32_1 = arith.constant 0 : i32
    return %arg1, %c0_i32, %c0_i32_0 : i32, i32, i32
  }
  func.func @transform_13(%arg0: i32, %arg1: i32) -> (i32, i32, i32) {
    %c0_i32 = arith.constant 0 : i32
    %c0_i32_0 = arith.constant 0 : i32
    %c0_i32_1 = arith.constant 0 : i32
    return %arg1, %c0_i32, %c0_i32_0 : i32, i32, i32
  }
  func.func @transform_14(%arg0: i32, %arg1: i32) -> (i32, i32, i32) {
    %c0_i32 = arith.constant 0 : i32
    %c0_i32_0 = arith.constant 0 : i32
    %c0_i32_1 = arith.constant 0 : i32
    return %arg1, %c0_i32, %c0_i32_0 : i32, i32, i32
  }
  func.func @transform_15(%arg0: i32, %arg1: i32) -> (i32, i32, i32) {
    %c0_i32 = arith.constant 0 : i32
    %c0_i32_0 = arith.constant 0 : i32
    %c0_i32_1 = arith.constant 0 : i32
    return %arg1, %c0_i32, %c0_i32_0 : i32, i32, i32
  }
  func.func @transform_16(%arg0: i32, %arg1: i32) -> (i32, i32, i32) {
    %c0_i32 = arith.constant 0 : i32
    %c0_i32_0 = arith.constant 0 : i32
    %c0_i32_1 = arith.constant 0 : i32
    return %arg1, %c0_i32, %c0_i32_0 : i32, i32, i32
  }
  func.func @transform_17(%arg0: i32, %arg1: i32) -> (i32, i32, i32) {
    %c0_i32 = arith.constant 0 : i32
    %c0_i32_0 = arith.constant 0 : i32
    %c0_i32_1 = arith.constant 0 : i32
    return %arg1, %c0_i32, %c0_i32_0 : i32, i32, i32
  }
  func.func @transform_18(%arg0: i32, %arg1: i32) -> (i32, i32, i32) {
    %c0_i32 = arith.constant 0 : i32
    %c0_i32_0 = arith.constant 0 : i32
    %c0_i32_1 = arith.constant 0 : i32
    return %arg0, %c0_i32, %c0_i32_0 : i32, i32, i32
  }
}

</mosaic_0001>

<bundles_post_ra>
// kernel: tpu_custom_call.1
= control target key start
LH: loop header
LB: loop body
LE: loop exit
PB: predicated region body
PF: predicated region fallthrough
CT: control target
= control target key end

     0   :  { %s6115_s0 = inlined_call_operand.hbm [shape: f32[2,16,128], index: 0, kind: input, shape index: {}]   ;;  %s6116_s1 = inlined_call_operand.hbm [shape: f32[2,16,128], index: 1, kind: input, shape index: {}]   ;;  %s6117_s2 = inlined_call_operand.hbm [shape: bf16[2,128,128], index: 2, kind: input, shape index: {}]   ;;  %s6118_s3 = inlined_call_operand.vmem [shape: f32[2,1,128], index: 3, kind: input, shape index: {}]   ;;  %s6119_s4 = inlined_call_operand.hbm [shape: bf16[2,128,128], index: 4, kind: input, shape index: {}]   ;;  %s6120_s5 = inlined_call_operand.vmem [shape: f32[2,1,128], index: 5, kind: input, shape index: {}]   ;;  %s6121_s6 = inlined_call_operand.hbm [shape: bf16[2,128,128], index: 6, kind: input, shape index: {}]   ;;  %s6122_s7 = inlined_call_operand.vmem [shape: f32[2,1,128], index: 7, kind: input, shape index: {}]   ;;  %s6123_s8 = inlined_call_operand.hbm [shape: bf16[2,8,16,128], index: 8, kind: input, shape index: {}]   ;;  %s6124_s9 = inlined_call_operand.vmem [shape: f32[2,1,128], index: 9, kind: input, shape index: {}]   ;;  %s6125_s10 = inlined_call_operand.vmem [shape: f32[2,1,128], index: 10, kind: input, shape index: {}]   ;;  %s6126_s11 = inlined_call_operand.vmem [shape: f32[2,1,128], index: 11, kind: input, shape index: {}]   ;;  %s6127_s12 = inlined_call_operand.hbm [shape: bf16[2,128,256], index: 12, kind: input, shape index: {}]   ;;  %s6128_s13 = inlined_call_operand.vmem [shape: f32[2,1,256], index: 13, kind: input, shape index: {}]   ;;  %s6129_s14 = inlined_call_operand.hbm [shape: bf16[2,256,128], index: 14, kind: input, shape index: {}]   ;;  %s6130_s15 = inlined_call_operand.vmem [shape: f32[2,1,128], index: 15, kind: input, shape index: {}]   ;;  %s6131_s16 = inlined_call_operand.vmem [shape: f32[2,1,128], index: 16, kind: input, shape index: {}]   ;;  %s6132_s17 = inlined_call_operand.vmem [shape: f32[2,1,128], index: 17, kind: input, shape index: {}]   ;;  %s6133_s18 = inlined_call_operand.hbm [shape: f32[2,16,128], index: 18, kind: output, shape index: {}]  }
   0x1   :  { %6185 = sst [smem:[#allocation46_spill]] %s6115_s0 }
   0x2   :  { %6186 = sst [smem:[#allocation47_spill]] %s6116_s1 }
   0x3   :  { %6187 = sst [smem:[#allocation48_spill]] %s6117_s2 }
   0x4   :  { %6188 = sst [smem:[#allocation49_spill]] %s6118_s3 }
   0x5   :  { %6189 = sst [smem:[#allocation50_spill]] %s6119_s4 }
   0x6   :  { %6190 = sst [smem:[#allocation51_spill]] %s6120_s5 }
   0x7   :  { %6191 = sst [smem:[#allocation52_spill]] %s6121_s6 }
   0x8   :  { %6192 = sst [smem:[#allocation53_spill]] %s6122_s7 }
   0x9   :  { %6193 = sst [smem:[#allocation54_spill]] %s6123_s8 }
   0xa   :  { %6194 = sst [smem:[#allocation55_spill]] %s6124_s9 }
   0xb   :  { %6195 = sst [smem:[#allocation56_spill]] %s6125_s10 }
   0xc   :  { %6196 = sst [smem:[#allocation57_spill]] %s6126_s11 }
   0xd   :  { %6197 = sst [smem:[#allocation58_spill]] %s6127_s12 }
   0xe   :  { %6198 = sst [smem:[#allocation59_spill]] %s6128_s13 }
   0xf   :  { %6199 = sst [smem:[#allocation60_spill]] %s6129_s14 }
  0x10   :  { %6200 = sst [smem:[#allocation61_spill]] %s6130_s15 }
  0x11   :  { %6201 = sst [smem:[#allocation62_spill]] %s6131_s16 }
  0x12   :  { %6202 = sst [smem:[#allocation63_spill]] %s6132_s17 }
  0x13   :  { %6203 = sst [smem:[#allocation64_spill]] %s6133_s18 }
  0x14   :  { %23 = vsyncpa [#allocation4], 0 }
  0x15   :  { %25 = vsyncpa [#allocation4 + $0x1], 0 }
  0x16   :  { %26 = vsyncpa [#allocation7], 0 }
  0x17   :  { %28 = vsyncpa [#allocation7 + $0x1], 0 }
  0x18   :  { %29 = vsyncpa [#allocation10], 0 }
  0x19   :  { %31 = vsyncpa [#allocation10 + $0x1], 0 }
  0x1a   :  { %32 = vsyncpa [#allocation13], 0 }
  0x1b   :  { %34 = vsyncpa [#allocation13 + $0x1], 0 }
  0x1c   :  { %35 = vsyncpa [#allocation16], 0 }
  0x1d   :  { %37 = vsyncpa [#allocation16 + $0x1], 0 }
  0x1e   :  { %38 = vsyncpa [#allocation5], 0 }
  0x1f   :  { %40 = vsyncpa [#allocation5 + $0x1], 0  ;;  %s5020_s27 = smov 0   ;;  %s5022_s28 = smov 0  }
  0x20   :  { %s5024_s29 = smov 0   ;;  %s5026_s30 = smov 0  }
  0x21   :  { %s5028_s0 = smov 0   ;;  %s5030_s19 = smov 0  }
  0x22   :  { %s5032_s1 = smov 0   ;;  %s5034_s20 = smov 0  }
  0x23   :  { %s5036_s21 = smov 0   ;;  %s5038_s22 = smov 0  }
  0x24   :  { %s5040_s2 = smov 0  }
  0x25 LB: > { %6204 = sst [smem:[#allocation25_spill]] %s4862_s28  ;;  %s5076_s23 = sadd.s32 4294967295, %s4898_s2   ;;  %s4898_s2 = sphi %s5040_s2, %s46_s2   ;;  %s4894_s22 = sphi %s5038_s22, %s6317_s22   ;;  %s4890_s21 = sphi %s5036_s21, %s6316_s21   ;;  %s4886_s20 = sphi %s5034_s20, %s6315_s20   ;;  %s4882_s1 = sphi %s5032_s1, %s6314_s1   ;;  %s4878_s19 = sphi %s5030_s19, %s6313_s19   ;;  %s4874_s0 = sphi %s5028_s0, %s6312_s0   ;;  %s4870_s30 = sphi %s5026_s30, %s6311_s30   ;;  %s4866_s29 = sphi %s5024_s29, %s6310_s29   ;;  %s4862_s28 = sphi %s5022_s28, %s6309_s28   ;;  %s4858_s27 = sphi %s5020_s27, %s6308_s27  }
  0x26   : > { %6205 = sst [smem:[#allocation26_spill]] %s4866_s29  ;;  %s3660_s24 = sadd.s32 4294967294, %s4898_s2  }
  0x27   : > { %6206 = sst [smem:[#allocation27_spill]] %s4870_s30  ;;  %p72_p0 = scmp.ne.s32.totalorder %s4878_s19, %s4874_s0 }
  0x28   : > { %6207 = sst [smem:[#allocation28_spill]] %s4874_s0  ;;  %p6146_p1 = scmp.eq.s32.totalorder %s4898_s2, 0 }
  0x29   : > { %6208 = sst [smem:[#allocation29_spill]] %s4878_s19  ;;  %p78_p2 = scmp.ne.s32.totalorder %s4874_s0, %s4870_s30 }
  0x2a   : > { %6209 = sst [smem:[#allocation30_spill]] %s4882_s1  ;;  %p6145_p3 = scmp.eq.s32.totalorder %s5076_s23, 0 }
  0x2b   : > { %6210 = sst [smem:[#allocation31_spill]] %s4886_s20  ;;  %p74_p4 = por %p6146_p1, %p72_p0 }
  0x2c   : > { %6211 = sst [smem:[#allocation32_spill]] %s4890_s21  ;;  %p544_p5 = scmp.eq.s32.totalorder %s5076_s23, 3 }
  0x2d   : > { %6212 = sst [smem:[#allocation33_spill]] %s4894_s22  ;;  %p5092_p6 = por %p6145_p3, %p78_p2 }
  0x2e   : > { %6213 = sst [smem:[#allocation34_spill]] %s4898_s2  ;;  %p550_p7 = scmp.eq.s32.totalorder %s3660_s24, 3 }
  0x2f   : > { %6214 = sst [smem:[#allocation35_spill]] %s5076_s23  ;;  %p5096_p8 = por %p544_p5, %p72_p0 }
  0x30   : > { %s6215_s18 = scalar_select %p5092_p6, 1, 0 }
  0x31   : > { %s6217_s25 = scalar_select %p5096_p8, 1, 0 }
  0x32   : > { %6216 = sst [smem:[#allocation36_spill]] %s6215_s18  ;;  %p5100_p9 = por %p550_p7, %p78_p2 }
  0x33   : > { %6218 = sst [smem:[#allocation37_spill]] %s6217_s25  ;;  %p6144_p10 = scmp.lt.s32.totalorder %s4898_s2, 4 }
  0x34   : > { %s6219_s26 = scalar_select %p5100_p9, 1, 0 }
  0x35   : > { %s6142_s30 = sand.u32 1, %s4878_s19   ;;  %s6143_s20 = sshll.u32 %s4894_s22, 8 }
  0x36   : > { %6220 = sst [smem:[#allocation38_spill]] %s6219_s26  ;;  %s5109_s17 = sshll.u32 %s6142_s30, 4 }
  0x37   : > { %p5113_p11 = pnand %p6144_p10, %p74_p4  ;;  %s5118_s24 = sand.u32 1, %s4898_s2  }
  0x38   : > { %s6222_s26 = sld [smem:[#allocation47_spill]]  ;;  %s595_s30 = scalar_lea.vmem [#allocation6], %s5109_s17 }
  0x39   : > { %s6221_s16 = scalar_select %p5113_p11, 1, 0 }
  0x3a   : > { %s602_s11 = sshll.u32 %s595_s30, 4  ;;  %s6148_s10 = scalar_lea.sflag [#allocation7], %s5118_s24  ;;  %s5128_s11 = int_to_ptr.vmem [resolvable:$true] %s602_s11 }
  0x3b   : > { %p6160_p0 = pneg %p5113_p11 }
  0x3e   : > { %s5125_s15 = scalar_lea.hbm %s6222_s26, %s6143_s20  ;;  %s4521_s20 = scalar_lea.hbm %s6222_s26, 512 }
  0x3f   : > { %s4516_s9 = scalar_lea.hbm %s5125_s15, 256  ;;  %p4522_p5 = scmp.lt.u32.totalorder %s5125_s15, %s6222_s26 }
  0x40   : > { %p4517_p13 = scmp.ne.s32.totalorder %s5125_s15, %s4516_s9  ;;  %p4523_p7 = scmp.lt.u32.totalorder %s4521_s20, %s4516_s9 }
  0x41   : > { %p4525_p3 = scmp.lt.u32.totalorder %s4516_s9, %s5125_s15 }
  0x42   : > { %p4519_p2 = pnand %p6160_p0, %p4517_p13  ;;  %p4524_p10 = por %p4523_p7, %p4522_p5 }
  0x44   : > { %p4520_p4 = pneg %p4519_p2  ;;  %p4526_p1 = por %p4525_p3, %p4524_p10 }
  0x46   : > { %p4527_p12 = pnand %p4526_p1, %p4520_p4 }
  0x48   : > { %4530 = shalt.err (!%p4527_p12)
}
  0x49   : > { %s4531_s30 = scalar_lea.vmem %s5128_s11, 256  ;;  %s4900_s13 = smov [#allocation6]  }
  0x4a   : > { %p4532_p13 = scmp.ne.s32.totalorder %s5128_s11, %s4531_s30  ;;  %s4536_s25 = sshll.u32 %s4900_s13, 4  ;;  %s4537_s25 = int_to_ptr.vmem [resolvable:$false] %s4536_s25 }
  0x4b   : > { %s4538_s5 = scalar_lea.vmem %s4537_s25, 512  ;;  %p4539_p8 = scmp.lt.s32.totalorder %s5128_s11, %s4537_s25 }
  0x4c   : > { %p4534_p2 = pnand %p4532_p13, %p6160_p0  ;;  %p4540_p5 = scmp.lt.s32.totalorder %s4538_s5, %s4531_s30 }
  0x4e   : > { %p4535_p9 = pneg %p4534_p2  ;;  %p4541_p7 = por %p4540_p5, %p4539_p8 }
  0x50   : > { %p4542_p3 = pnand %p4541_p7, %p4535_p9 }
  0x52   : > { %4545 = shalt.err (!%p4542_p3)
}
  0x53   : > { %s6149_s7 = smov 128   ;;  %s6151_s9 = smov 8  }
  0x54   : > { %4136 = dma.hbm_to_vmem [thread:$0]  (!%p5113_p11), %s5125_s15, 256, %s5128_s11, %s6148_s10, %s6149_s7, %s6149_s7, %s6151_s9  }
  0x55   : > { %p797_p1 = scmp.lt.s32.totalorder %s4898_s2, 5  ;;  %p6223_p8 = scmp.ge.s32.totalorder %s4898_s2, 1 }
  0x56   : > { %s55_s30 = sadd.s32 1, %s4890_s21  ;;  %s117_s13 = sadd.s32 1, %s4866_s29 }
  0x57   : > { %p5165_p9 = pnand %p6223_p8, %p797_p1  ;;  %p56_p10 = scmp.ge.s32.totalorder %s55_s30, 2 }
  0x58   : > { %p124_p12 = scmp.ne.s32.totalorder %s4866_s29, %s4862_s28  ;;  %p130_p4 = scmp.ne.s32.totalorder %s4862_s28, %s4858_s27 }
  0x59   : > { %s6224_s20 = scalar_select %p5165_p9, 1, 0 }
  0x5a   : > { %s5176_s25 = sand.u32 1, %s4866_s29   ;;  %s6319_s30 = smov (%p56_p10, %s55_s30), 0 }
  0x5b   : > { %6225 = sst [smem:[#allocation39_spill]] %s6224_s20  ;;  %s6227_s11 = sadd.s32 1, %s4894_s22 }
  0x5c   : > { %6226 = sst [smem:[#allocation40_spill]] %s6319_s30  ;;  %s6321_s11 = smov (!%p56_p10, %s6227_s11), %s4894_s22 }
  0x5d   : > { %s114_s15 = ssub.s32 %s4890_s21, %s6319_s30  ;;  %p6228_p13 = scmp.eq.s32.totalorder %s4898_s2, 0 }
  0x5e   : > { %p60_p5 = scmp.ge.s32.totalorder %s6321_s11, 2  ;;  %p115_p7 = scmp.eq.s32.totalorder %s114_s15, 0 }
  0x5f   : > { %p126_p2 = por %p124_p12, %p6228_p13  ;;  %p6229_p3 = scmp.eq.s32.totalorder %s5076_s23, 0 }
  0x60   : > { %s5194_s27 = sshll.u32 %s5176_s25, 6  ;;  %s6323_s11 = smov (%p60_p5, %s6321_s11), 0 }
  0x61   : > { %p5189_p1 = por %p130_p4, %p6229_p3  ;;  %6232 = sst [smem:[#allocation42_spill]] %s6323_s11 }
  0x62   : > { %s5199_s10 = scalar_select %p115_p7, %s4866_s29, %s117_s13  }
  0x63   : > { %s6230_s5 = scalar_select %p5189_p1, 1, 0 }
  0x64   : > { %6233 = sst [smem:[#allocation43_spill]] %s5199_s10  ;;  %s62_s7 = ssub.s32 %s4894_s22, %s6323_s11 }
  0x65   : > { %6231 = sst [smem:[#allocation41_spill]] %s6230_s5  ;;  %s5204_s9 = sshll.u32 %s4890_s21, 10 }
  0x66   : > { %p63_p8 = scmp.eq.s32.totalorder %s62_s7, 0  ;;  %p6234_p10 = scmp.lt.s32.totalorder %s4898_s2, 4 }
  0x67   : > { %s6236_s26 = sadd.s32 1, %s4878_s19  ;;  %s6238_s4 = sld [smem:[#allocation50_spill]] }
  0x68   : > { %p5208_p12 = pnand %p6234_p10, %p126_p2  ;;  %s643_s13 = scalar_lea.vmem [#allocation9], %s5194_s27 }
  0x69   : > { %s5215_s30 = scalar_select %p63_p8, %s4878_s19, %s6236_s26  }
  0x6a   : > { %s6235_s15 = scalar_select %p5208_p12, 1, 0 }
  0x6b   : > { %6237 = sst [smem:[#allocation44_spill]] %s5215_s30  ;;  %s650_s7 = sshll.u32 %s643_s13, 4  ;;  %s5224_s7 = int_to_ptr.vmem [resolvable:$true] %s650_s7 }
  0x6c   : > { %p5231_p13 = pneg %p5208_p12 }
  0x6d   : > { %s5221_s5 = scalar_lea.hbm %s6238_s4, %s5204_s9  ;;  %s4551_s30 = scalar_lea.hbm %s6238_s4, 2048 }
  0x6e   : > { %s4546_s10 = scalar_lea.hbm %s5221_s5, 1024  ;;  %p4552_p7 = scmp.lt.u32.totalorder %s5221_s5, %s6238_s4 }
  0x6f   : > { %p4547_p4 = scmp.ne.s32.totalorder %s5221_s5, %s4546_s10  ;;  %p4553_p3 = scmp.lt.u32.totalorder %s4551_s30, %s4546_s10 }
  0x70   : > { %p4555_p10 = scmp.lt.u32.totalorder %s4546_s10, %s5221_s5 }
  0x71   : > { %p4549_p2 = pnand %p5231_p13, %p4547_p4  ;;  %p4554_p8 = por %p4553_p3, %p4552_p7 }
  0x73   : > { %p4550_p5 = pneg %p4549_p2  ;;  %p4556_p0 = por %p4555_p10, %p4554_p8 }
  0x75   : > { %p4557_p1 = pnand %p4556_p0, %p4550_p5 }
  0x77   : > { %4560 = shalt.err (!%p4557_p1)
}
  0x78   : > { %s4561_s11 = scalar_lea.vmem %s5224_s7, 1024  ;;  %s4903_s3 = smov [#allocation9]  }
  0x79   : > { %p4562_p4 = scmp.ne.s32.totalorder %s5224_s7, %s4561_s11  ;;  %s4566_s1 = sshll.u32 %s4903_s3, 4  ;;  %s4567_s1 = int_to_ptr.vmem [resolvable:$false] %s4566_s1 }
  0x7a   : > { %s4568_s29 = scalar_lea.vmem %s4567_s1, 2048  ;;  %p4569_p9 = scmp.lt.s32.totalorder %s5224_s7, %s4567_s1 }
  0x7b   : > { %p4564_p2 = pnand %p4562_p4, %p5231_p13  ;;  %p4570_p11 = scmp.lt.s32.totalorder %s4568_s29, %s4561_s11 }
  0x7d   : > { %p4565_p6 = pneg %p4564_p2  ;;  %p4571_p7 = por %p4570_p11, %p4569_p9 }
  0x7f   : > { %p4572_p3 = pnand %p4571_p7, %p4565_p6 }
  0x81   : > { %4575 = shalt.err (!%p4572_p3)
}
  0x82   : > { %s4904_s10 = smov 64   ;;  %s4905_s30 = smov 4  }
  0x83   : > { %s6240_s13 = scalar_lea.sflag [#allocation10], %s5118_s24  ;;  %s6241_s8 = sld [smem:[#allocation54_spill]] }
  0x84   : > { %4142 = dma.hbm_to_vmem [thread:$0]  (!%p5208_p12), %s5221_s5, 1024, %s5224_s7, %s6240_s13, %s4904_s10, %s4904_s10, %s4905_s30  }
  0x85   : > { %s697_s29 = scalar_lea.vmem [#allocation12], %s5194_s27  ;;  %s6174_s2 = scalar_lea.sflag [#allocation13], %s5118_s24 }
  0x86   : > { %s704_s4 = sshll.u32 %s697_s29, 4  ;;  %s5266_s4 = int_to_ptr.vmem [resolvable:$true] %s704_s4 }
  0x89   : > { %s5263_s1 = scalar_lea.hbm %s6241_s8, %s5204_s9  ;;  %s4581_s13 = scalar_lea.hbm %s6241_s8, 2048 }
  0x8a   : > { %s4576_s28 = scalar_lea.hbm %s5263_s1, 1024  ;;  %p4582_p9 = scmp.lt.u32.totalorder %s5263_s1, %s6241_s8 }
  0x8b   : > { %p4577_p6 = scmp.ne.s32.totalorder %s5263_s1, %s4576_s28  ;;  %p4583_p1 = scmp.lt.u32.totalorder %s4581_s13, %s4576_s28 }
  0x8c   : > { %p4585_p8 = scmp.lt.u32.totalorder %s4576_s28, %s5263_s1 }
  0x8d   : > { %p4579_p11 = pnand %p4577_p6, %p5231_p13  ;;  %p4584_p5 = por %p4583_p1, %p4582_p9 }
  0x8f   : > { %p4580_p0 = pneg %p4579_p11  ;;  %p4586_p10 = por %p4585_p8, %p4584_p5 }
  0x91   : > { %p4587_p4 = pnand %p4586_p10, %p4580_p0 }
  0x93   : > { %4590 = shalt.err (!%p4587_p4)
}
  0x94   : > { %s4591_s29 = scalar_lea.vmem %s5266_s4, 1024  ;;  %s4906_s5 = smov [#allocation12]  }
  0x95   : > { %p4592_p2 = scmp.ne.s32.totalorder %s5266_s4, %s4591_s29  ;;  %s4596_s7 = sshll.u32 %s4906_s5, 4  ;;  %s4597_s7 = int_to_ptr.vmem [resolvable:$false] %s4596_s7 }
  0x96   : > { %s4598_s11 = scalar_lea.vmem %s4597_s7, 2048  ;;  %p4599_p6 = scmp.lt.s32.totalorder %s5266_s4, %s4597_s7 }
  0x97   : > { %p4594_p7 = pnand %p4592_p2, %p5231_p13  ;;  %p4600_p11 = scmp.lt.s32.totalorder %s4598_s11, %s4591_s29 }
  0x99   : > { %p4595_p3 = pneg %p4594_p7  ;;  %p4601_p9 = por %p4600_p11, %p4599_p6 }
  0x9b   : > { %p4602_p1 = pnand %p4601_p9, %p4595_p3 }
  0x9d   : > { %4605 = shalt.err (!%p4602_p1)
}
  0x9e   : > { %4148 = dma.hbm_to_vmem [thread:$0]  (!%p5208_p12), %s5263_s1, 1024, %s5266_s4, %s6174_s2, %s4904_s10, %s4904_s10, %s4905_s30  }
  0x9f   : > { %s6242_s28 = sshll.u32 %s4894_s22, 8  ;;  %s6243_s29 = sld [smem:[#allocation46_spill]] }
  0xa0   : > { %s574_s11 = scalar_lea.vmem [#allocation3], %s5109_s17  ;;  %s6245_s0 = sld [smem:[#allocation48_spill]] }
  0xa1   : > { %s581_s8 = sshll.u32 %s574_s11, 4  ;;  %s6247_s4 = sand.u32 1, %s4878_s19   ;;  %s5303_s8 = int_to_ptr.vmem [resolvable:$true] %s581_s8 }
  0xa2   : > { %s5313_s1 = scalar_lea.sflag [#allocation4], %s6247_s4  ;;  %p6248_p5 = scmp.ne.s32.totalorder %s6221_s16, 0 }
  0xa4   : > { %p6249_p8 = pneg %p6248_p5 }
  0xa5   : > { %s6244_s5 = smov %s6243_s29  ;;  %s5300_s7 = scalar_lea.hbm %s6243_s29, %s6242_s28 }
  0xa6   : > { %s6246_s14 = smov %s6245_s0  ;;  %s5309_s20 = scalar_lea.hbm %s6245_s0, %s5204_s9 }
  0xa7   : > { %s4606_s2 = scalar_lea.hbm %s5300_s7, 256  ;;  %s4611_s17 = scalar_lea.hbm %s6244_s5, 512 }
  0xa8   : > { %p4607_p0 = scmp.ne.s32.totalorder %s5300_s7, %s4606_s2  ;;  %p4612_p2 = scmp.lt.u32.totalorder %s5300_s7, %s6244_s5 }
  0xa9   : > { %p4613_p7 = scmp.lt.u32.totalorder %s4611_s17, %s4606_s2  ;;  %p4615_p6 = scmp.lt.u32.totalorder %s4606_s2, %s5300_s7 }
  0xaa   : > { %p4609_p10 = pnand %p4607_p0, %p6249_p8 }
  0xab   : > { %p4614_p3 = por %p4613_p7, %p4612_p2 }
  0xac   : > { %p4610_p4 = pneg %p4609_p10 }
  0xad   : > { %p4616_p11 = por %p4615_p6, %p4614_p3 }
  0xaf   : > { %p4617_p9 = pnand %p4616_p11, %p4610_p4 }
  0xb1   : > { %4620 = shalt.err (!%p4617_p9)
}
  0xb2   : > { %s4621_s18 = scalar_lea.vmem %s5303_s8, 256  ;;  %p6250_p0 = pmov %p6249_p8 }
  0xb3   : > { %p4622_p1 = scmp.ne.s32.totalorder %s5303_s8, %s4621_s18  ;;  %s4907_s0 = smov [#allocation3]  }
  0xb4   : > { %s4626_s23 = sshll.u32 %s4907_s0, 4  ;;  %s4627_s23 = int_to_ptr.vmem [resolvable:$false] %s4626_s23 }
  0xb5   : > { %p4624_p8 = pnand %p4622_p1, %p6250_p0  ;;  %s4628_s11 = scalar_lea.vmem %s4627_s23, 512 }
  0xb6   : > { %p4629_p12 = scmp.lt.s32.totalorder %s5303_s8, %s4627_s23  ;;  %p4630_p2 = scmp.lt.s32.totalorder %s4628_s11, %s4621_s18 }
  0xb7   : > { %p4625_p10 = pneg %p4624_p8 }
  0xb8   : > { %p4631_p7 = por %p4630_p2, %p4629_p12 }
  0xba   : > { %p4632_p3 = pnand %p4631_p7, %p4625_p10 }
  0xbc   : > { %4635 = shalt.err (!%p4632_p3)
}
  0xbd   : > { %s6251_s2 = smov 8   ;;  %s6252_s4 = smov 128  }
  0xbe   : > { %4133 = dma.hbm_to_vmem [thread:$0]  (!%p6248_p5), %s5300_s7, 256, %s5303_s8, %s5313_s1, %s6252_s4, %s6252_s4, %s6251_s2  }
  0xbf   : > { %s616_s28 = scalar_lea.vmem [#allocation8], %s5194_s27  ;;  %s6253_s6 = sld [smem:[#allocation52_spill]] }
  0xc0   : > { %s623_s13 = sshll.u32 %s616_s28, 4  ;;  %s4636_s29 = scalar_lea.hbm %s5309_s20, 1024  ;;  %s5343_s13 = int_to_ptr.vmem [resolvable:$true] %s623_s13 }
  0xc1   : > { %p4637_p12 = scmp.ne.s32.totalorder %s5309_s20, %s4636_s29  ;;  %s4641_s23 = scalar_lea.hbm %s6246_s14, 2048 }
  0xc2   : > { %p4642_p5 = scmp.lt.u32.totalorder %s5309_s20, %s6246_s14  ;;  %p4643_p11 = scmp.lt.u32.totalorder %s4641_s23, %s4636_s29 }
  0xc3   : > { %p4639_p4 = pnand %p4637_p12, %p5231_p13  ;;  %p4645_p1 = scmp.lt.u32.totalorder %s4636_s29, %s5309_s20 }
  0xc4   : > { %p4644_p9 = por %p4643_p11, %p4642_p5 }
  0xc5   : > { %s5349_s3 = scalar_lea.hbm %s6253_s6, %s5204_s9  ;;  %p4640_p6 = pneg %p4639_p4 }
  0xc6   : > { %p4646_p0 = por %p4645_p1, %p4644_p9 }
  0xc8   : > { %p4647_p8 = pnand %p4646_p0, %p4640_p6 }
  0xca   : > { %4650 = shalt.err (!%p4647_p8)
}
  0xcb   : > { %s4651_s9 = scalar_lea.vmem %s5343_s13, 1024  ;;  %s4908_s7 = smov [#allocation8]  }
  0xcc   : > { %p4652_p10 = scmp.ne.s32.totalorder %s5343_s13, %s4651_s9  ;;  %s4656_s1 = sshll.u32 %s4908_s7, 4  ;;  %s4657_s1 = int_to_ptr.vmem [resolvable:$false] %s4656_s1 }
  0xcd   : > { %s4658_s28 = scalar_lea.vmem %s4657_s1, 2048  ;;  %p4659_p3 = scmp.lt.s32.totalorder %s5343_s13, %s4657_s1 }
  0xce   : > { %p4654_p2 = pnand %p4652_p10, %p5231_p13  ;;  %p4660_p12 = scmp.lt.s32.totalorder %s4658_s28, %s4651_s9 }
  0xd0   : > { %p4655_p7 = pneg %p4654_p2  ;;  %p4661_p4 = por %p4660_p12, %p4659_p3 }
  0xd2   : > { %p4662_p5 = pnand %p4661_p4, %p4655_p7 }
  0xd4   : > { %4665 = shalt.err (!%p4662_p5)
}
  0xd5   : > { %p6254_p6 = scmp.ne.s32.totalorder %s6235_s15, 0  ;;  %s6255_s17 = scalar_lea.sflag [#allocation7], %s5118_s24 }
  0xd6   : > { %s670_s16 = scalar_lea.vmem [#allocation11], %s5194_s27  ;;  %s3681_s18 = sshll.u32 %s5176_s25, 7 }
  0xd7   : > { %4139 = dma.hbm_to_vmem [thread:$0]  (!%p6254_p6), %s5309_s20, 1024, %s5343_s13, %s6255_s17, %s4904_s10, %s4904_s10, %s4905_s30  }
  0xd8   : > { %s677_s29 = sshll.u32 %s670_s16, 4  ;;  %s4666_s0 = scalar_lea.hbm %s5349_s3, 1024  ;;  %s5379_s29 = int_to_ptr.vmem [resolvable:$true] %s677_s29 }
  0xd9   : > { %p4667_p11 = scmp.ne.s32.totalorder %s5349_s3, %s4666_s0  ;;  %s4671_s8 = scalar_lea.hbm %s6253_s6, 2048 }
  0xda   : > { %p4672_p0 = scmp.lt.u32.totalorder %s5349_s3, %s6253_s6  ;;  %p4673_p8 = scmp.lt.u32.totalorder %s4671_s8, %s4666_s0 }
  0xdb   : > { %p4669_p9 = pnand %p4667_p11, %p5231_p13  ;;  %p4675_p2 = scmp.lt.u32.totalorder %s4666_s0, %s5349_s3 }
  0xdc   : > { %p4674_p10 = por %p4673_p8, %p4672_p0 }
  0xdd   : > { %p4670_p1 = pneg %p4669_p9 }
  0xde   : > { %p4676_p7 = por %p4675_p2, %p4674_p10 }
  0xe0   : > { %p4677_p3 = pnand %p4676_p7, %p4670_p1 }
  0xe2   : > { %4680 = shalt.err (!%p4677_p3)
}
  0xe3   : > { %s4681_s20 = scalar_lea.vmem %s5379_s29, 1024  ;;  %s4909_s27 = smov [#allocation11]  }
  0xe4   : > { %p4682_p12 = scmp.ne.s32.totalorder %s5379_s29, %s4681_s20  ;;  %s4686_s13 = sshll.u32 %s4909_s27, 4  ;;  %s4687_s13 = int_to_ptr.vmem [resolvable:$false] %s4686_s13 }
  0xe5   : > { %s4688_s1 = scalar_lea.vmem %s4687_s13, 2048  ;;  %p4689_p11 = scmp.lt.s32.totalorder %s5379_s29, %s4687_s13 }
  0xe6   : > { %p4684_p4 = pnand %p4682_p12, %p5231_p13  ;;  %p4690_p9 = scmp.lt.s32.totalorder %s4688_s1, %s4681_s20 }
  0xe8   : > { %p4685_p5 = pneg %p4684_p4  ;;  %p4691_p0 = por %p4690_p9, %p4689_p11 }
  0xea   : > { %p4692_p8 = pnand %p4691_p0, %p4685_p5 }
  0xec   : > { %4695 = shalt.err (!%p4692_p8)
}
  0xed   : > { %s6256_s28 = scalar_lea.sflag [#allocation10], %s5118_s24  ;;  %s3808_s17 = sshll.u32 %s4890_s21, 11 }
  0xee   : > { %4145 = dma.hbm_to_vmem [thread:$0]  (!%p6254_p6), %s5349_s3, 1024, %s5379_s29, %s6256_s28, %s4904_s10, %s4904_s10, %s4905_s30  }
  0xef   : > { %s736_s16 = scalar_lea.vmem [#allocation14], %s3681_s18  ;;  %s6257_s12 = sld [smem:[#allocation58_spill]] }
  0xf0   : > { %s743_s0 = sshll.u32 %s736_s16, 4  ;;  %s5417_s0 = int_to_ptr.vmem [resolvable:$true] %s743_s0 }
  0xf5   : > { %s5415_s8 = scalar_lea.hbm %s6257_s12, %s3808_s17  ;;  %s4701_s7 = scalar_lea.hbm %s6257_s12, 4096 }
  0xf6   : > { %s4696_s9 = scalar_lea.hbm %s5415_s8, 2048  ;;  %p4702_p7 = scmp.lt.u32.totalorder %s5415_s8, %s6257_s12 }
  0xf7   : > { %p4697_p1 = scmp.ne.s32.totalorder %s5415_s8, %s4696_s9  ;;  %p4703_p3 = scmp.lt.u32.totalorder %s4701_s7, %s4696_s9 }
  0xf8   : > { %p4705_p4 = scmp.lt.u32.totalorder %s4696_s9, %s5415_s8 }
  0xf9   : > { %p4699_p10 = pnand %p4697_p1, %p5231_p13  ;;  %p4704_p12 = por %p4703_p3, %p4702_p7 }
  0xfb   : > { %p4700_p2 = pneg %p4699_p10  ;;  %p4706_p5 = por %p4705_p4, %p4704_p12 }
  0xfd   : > { %p4707_p11 = pnand %p4706_p5, %p4700_p2 }
  0xff   : > { %4710 = shalt.err (!%p4707_p11)
}
 0x100   : > { %s4711_s13 = scalar_lea.vmem %s5417_s0, 2048  ;;  %s4910_s1 = smov [#allocation14]  }
 0x101   : > { %p4712_p9 = scmp.ne.s32.totalorder %s5417_s0, %s4711_s13  ;;  %s4716_s28 = sshll.u32 %s4910_s1, 4  ;;  %s4717_s28 = int_to_ptr.vmem [resolvable:$false] %s4716_s28 }
 0x102   : > { %s4718_s16 = scalar_lea.vmem %s4717_s28, 4096  ;;  %p4719_p1 = scmp.lt.s32.totalorder %s5417_s0, %s4717_s28 }
 0x103   : > { %p4714_p0 = pnand %p4712_p9, %p5231_p13  ;;  %p4720_p10 = scmp.lt.s32.totalorder %s4718_s16, %s4711_s13 }
 0x105   : > { %p4715_p8 = pneg %p4714_p0  ;;  %p4721_p7 = por %p4720_p10, %p4719_p1 }
 0x107   : > { %p4722_p3 = pnand %p4721_p7, %p4715_p8 }
 0x109   : > { %4725 = shalt.err (!%p4722_p3)
}
 0x10a   : > { %s6258_s23 = scalar_lea.sflag [#allocation13], %s5118_s24  ;;  %s6259_s3 = sld [smem:[#allocation60_spill]] }
 0x10b   : > { %4151 = dma.hbm_to_vmem [thread:$0]  (!%p6254_p6), %s5415_s8, 2048, %s5417_s0, %s6258_s23, %s6252_s4, %s6252_s4, %s6251_s2  }
 0x10c   : > { %s764_s7 = scalar_lea.vmem [#allocation15], %s3681_s18  ;;  %s761_s20 = scalar_lea.sflag [#allocation16], %s5176_s25 }
 0x10d   : > { %s771_s24 = sshll.u32 %s764_s7, 4  ;;  %s5454_s24 = int_to_ptr.vmem [resolvable:$true] %s771_s24 }
 0x110   : > { %s5450_s29 = scalar_lea.hbm %s6259_s3, %s3808_s17  ;;  %s4731_s17 = scalar_lea.hbm %s6259_s3, 4096 }
 0x111   : > { %s4726_s27 = scalar_lea.hbm %s5450_s29, 2048  ;;  %p4732_p5 = scmp.lt.u32.totalorder %s5450_s29, %s6259_s3 }
 0x112   : > { %p4727_p2 = scmp.ne.s32.totalorder %s5450_s29, %s4726_s27  ;;  %p4733_p11 = scmp.lt.u32.totalorder %s4731_s17, %s4726_s27 }
 0x113   : > { %p4735_p0 = scmp.lt.u32.totalorder %s4726_s27, %s5450_s29 }
 0x114   : > { %p4729_p12 = pnand %p4727_p2, %p5231_p13  ;;  %p4734_p9 = por %p4733_p11, %p4732_p5 }
 0x116   : > { %p4730_p4 = pneg %p4729_p12  ;;  %p4736_p8 = por %p4735_p0, %p4734_p9 }
 0x118   : > { %p4737_p1 = pnand %p4736_p8, %p4730_p4 }
 0x11a   : > { %4740 = shalt.err (!%p4737_p1)
}
 0x11b   : > { %s4741_s18 = scalar_lea.vmem %s5454_s24, 2048  ;;  %s4911_s13 = smov [#allocation15]  }
 0x11c   : > { %p4742_p10 = scmp.ne.s32.totalorder %s5454_s24, %s4741_s18  ;;  %s4746_s1 = sshll.u32 %s4911_s13, 4  ;;  %s4747_s1 = int_to_ptr.vmem [resolvable:$false] %s4746_s1 }
 0x11d   : > { %s4748_s28 = scalar_lea.vmem %s4747_s1, 4096  ;;  %p4749_p2 = scmp.lt.s32.totalorder %s5454_s24, %s4747_s1 }
 0x11e   : > { %p4744_p7 = pnand %p4742_p10, %p5231_p13  ;;  %p4750_p12 = scmp.lt.s32.totalorder %s4748_s28, %s4741_s18 }
 0x120   : > { %p4745_p3 = pneg %p4744_p7  ;;  %p4751_p5 = por %p4750_p12, %p4749_p2 }
 0x122   : > { %p4752_p11 = pnand %p4751_p5, %p4745_p3 }
 0x124   : > { %4755 = shalt.err (!%p4752_p11)
}
 0x125   : > { %4154 = dma.hbm_to_vmem [thread:$0]  (!%p6254_p6), %s5450_s29, 2048, %s5454_s24, %s761_s20, %s4904_s10, %s4904_s10, %s4905_s30  }
 0x126   : > { %s6260_s26 = sld [smem:[#allocation39_spill]] }
 0x12c   : > { %p6261_p13 = scmp.ne.s32.totalorder %s6260_s26, 0 }
 0x12e   : > { %801 = sbr.rel (%p6261_p13) target bundleno = 2882 (0xb42), region = 92 }
 0x135   : > { %s6262_s16 = sld [smem:[#allocation28_spill]]  ;;  %s6263_s23 = sld [smem:[#allocation36_spill]] }
 0x13b   : > { %s5486_s11 = sand.u32 1, %s6262_s16   ;;  %p6265_p4 = scmp.ne.s32.totalorder %s6263_s23, 0 }
 0x13c   : > { %6264 = sst [smem:[#allocation45_spill]] %s5486_s11  ;;  %s5489_s9 = sshll.u32 %s5486_s11, 4 }
 0x13d   : > { %s804_s15 = scalar_lea.sflag [#allocation4], %s5486_s11 }
 0x13e   : > { %4829 = dma.done.wait (%p6265_p4), %s804_s15, 256  }
 0x13f   : > { %4831 = vsyncadd (%p6265_p4), %s804_s15, 4294967040  ;;  %s6266_s25 = sld [smem:[#allocation35_spill]] }
 0x145   : > { %s812_s10 = sand.u32 1, %s6266_s25  }
 0x146   : > { %s813_s30 = scalar_lea.sflag [#allocation7], %s812_s10 }
 0x147   : > { %4833 = dma.done.wait (%p6265_p4), %s813_s30, 256  }
 0x148   : > { %4835 = vsyncadd (%p6265_p4), %s813_s30, 4294967040  ;;  %s6267_s24 = sld [smem:[#allocation25_spill]]  ;;  %s6268_s20 = sld [smem:[#allocation41_spill]] }
 0x14e   : > { %s823_s27 = sand.u32 1, %s6267_s24   ;;  %p6269_p6 = scmp.ne.s32.totalorder %s6268_s20, 0 }
 0x14f   : > { %s3690_s2 = sshll.u32 %s823_s27, 6 }
 0x150   : > { %s5504_s4 = scalar_lea.vmem [#allocation8], %s3690_s2 }
 0x151   : > { %4837 = dma.done.wait (%p6269_p6), %s813_s30, 1024  }
 0x152   : > { %4839 = vsyncadd (%p6269_p6), %s813_s30, 4294966272  ;;  %s831_s17 = scalar_lea.sflag [#allocation10], %s812_s10  ;;  %s5510_s0 = scalar_lea.vmem [#allocation9], %s3690_s2 }
 0x153   : > { %4841 = dma.done.wait (%p6269_p6), %s831_s17, 2048  }
 0x154   : > { %4843 = vsyncadd (%p6269_p6), %s831_s17, 4294965248  ;;  %s5516_s8 = scalar_lea.vmem [#allocation11], %s3690_s2  ;;  %s849_s18 = scalar_lea.sflag [#allocation13], %s812_s10 }
 0x155   : > { %s5518_s13 = scalar_lea.vmem [#allocation12], %s3690_s2 }
 0x156   : > { %4845 = dma.done.wait (%p6269_p6), %s849_s18, 3072  }
 0x157   : > { %4847 = vsyncadd (%p6269_p6), %s849_s18, 4294964224  ;;  %s3694_s1 = sshll.u32 %s823_s27, 7  ;;  %s867_s26 = scalar_lea.sflag [#allocation16], %s823_s27 }
 0x158   : > { %s5524_s28 = scalar_lea.vmem [#allocation14], %s3694_s1  ;;  %s5526_s16 = scalar_lea.vmem [#allocation15], %s3694_s1 }
 0x159   : > { %4849 = dma.done.wait (%p6269_p6), %s867_s26, 2048  }
 0x15a   : > { %4851 = vsyncadd (%p6269_p6), %s867_s26, 4294965248  ;;  %s6270_s23 = sld [smem:[#allocation30_spill]]  ;;  %s6273_s26 = sld [smem:[#allocation53_spill]] }
 0x15b   : > { %s6276_s19 = sld [smem:[#allocation57_spill]]  ;;  %s6277_s27 = sld [smem:[#allocation61_spill]] }
 0x15c   : > { %s6278_s1 = sld [smem:[#allocation59_spill]]  ;;  %s6279_s10 = sld [smem:[#allocation62_spill]] }
 0x15d   : > { %s6280_s5 = sld [smem:[#allocation63_spill]]  ;;  %s5579_s21 = scalar_lea.vmem [#allocation17], %s5489_s9 }
 0x160   : > { %p989_p9 = scmp.lt.s32.totalorder %s6270_s23, 1  ;;  %p3698_p0 = scmp.ne.s32.totalorder %s6270_s23, 0 }
 0x162   : > { %s5534_s15 = scalar_select %p989_p9, %s6270_s23, 1 }
 0x163   : > { %1024 = sbr.rel (%p3698_p0) target bundleno = 363 (0x16b), region = 128 }
 0x164   : > { %s997_s29 = scalar_lea.vmem %s6273_s26, %s5534_s15  ;;  %s1006_s30 = scalar_lea.vmem %s6276_s19, %s5534_s15 }
 0x165   : > { %s3697_s24 = sshll.u32 %s5534_s15, 1  ;;  %s1013_s2 = scalar_lea.vmem %s6277_s27, %s5534_s15 }
 0x166   : > { %s5568_s26 = scalar_lea.vmem %s6278_s1, %s3697_s24  ;;  %s1016_s3 = scalar_lea.vmem %s6279_s10, %s5534_s15 }
 0x167   : > { %s1019_s14 = scalar_lea.vmem %s6280_s5, %s5534_s15  ;;  %s6281_s19 = scalar_lea.vmem (!%p3698_p0), [#allocation3], %s5489_s9 }
 0x168   : > { %v1025_v0 = vld [vmem:[%s6281_s19] sm:$0xff] (!%p3698_p0)  ;;  %s6282_s22 = smov (!%p3698_p0), %s6281_s19 }
 0x169   : > { %v1026_v1 = vld [vmem:[%s6282_s22 + $0x8] sm:$0xff] (!%p3698_p0)  ;;  %1027 = vst [vmem:[#allocation2] sm:$0xff] (!%p3698_p0), %v1025_v0 }
 0x16a   : > { %1028 = vst [vmem:[#allocation2 + $0x8] sm:$0xff] %v1026_v1 }
 0x16b PF: > { %v4370_v2 = vld [vmem:[%s5510_s0] sm:$0xff]   ;;  %v4912_v3 = vmov 0.0   ;;  %v4372_v5 = vld [vmem:[%s5510_s0 + $0x8] sm:$0xff]   ;;  %vm4913_vm0 = vmmov 0   ;;  %v4374_v7 = vld [vmem:[%s5510_s0 + $0x10] sm:$0xff]   ;;  %s6283_s11 = scalar_lea.vmem [#allocation6], %s5489_s9 }
 0x16c   : > { %3928 = vmatprep.subr.bf16.mxu1 %v4912_v3  ;;  %3908 = vmatprep.subr.bf16.mxu0 %v4912_v3  ;;  %v4371_v4 = vld [vmem:[%s5504_s4] sm:$0xff]   ;;  %v4373_v6 = vld [vmem:[%s5504_s4 + $0x8] sm:$0xff]   ;;  %v4375_v8 = vld [vmem:[%s5504_s4 + $0x10] sm:$0xff]   ;;  %s6284_s23 = smov %s6283_s11  ;;  %s6287_s27 = sld [smem:[#allocation51_spill]]  ;;  %vm1529_vm1 = vcmask 130048  }
 0x16d   : > { %3929 = vmatpush3.bf16.msra.mxu1 %v4370_v2  ;;  %3944 = vmatprep.mubr.msk.bf16.mxu1 %vm4913_vm0, %v4912_v3  ;;  %v4376_v9 = vld [vmem:[%s5510_s0 + $0x18] sm:$0xff]   ;;  %v4378_v11 = vld [vmem:[%s5510_s0 + $0x20] sm:$0xff]   ;;  %v4380_v13 = vld [vmem:[%s5510_s0 + $0x28] sm:$0xff]   ;;  %s4915_s1 = smov 112   ;;  %s4916_s7 = smov 64  }
 0x16e   : > { %3909 = vmatpush3.bf16.msra.mxu0 %v4371_v4  ;;  %3930 = vmatprep.subr.bf16.mxu1 %v4912_v3  ;;  %v4377_v10 = vld [vmem:[%s5504_s4 + $0x18] sm:$0xff]   ;;  %v4379_v12 = vld [vmem:[%s5504_s4 + $0x20] sm:$0xff]   ;;  %v4381_v14 = vld [vmem:[%s5504_s4 + $0x28] sm:$0xff]   ;;  %s4917_s25 = smov 80   ;;  %s4918_s10 = smov 48  }
 0x16f   : > { %3910 = vmatprep.subr.bf16.mxu0 %v4912_v3  ;;  %3924 = vmatprep.mubr.msk.bf16.mxu0 %vm4913_vm0, %v4912_v3  ;;  %v4382_v15 = vld [vmem:[%s5510_s0 + $0x30] sm:$0xff]   ;;  %v1032_v19 = vld [vmem:[%s6284_s23 + $0x8] sm:$0xff]  ;;  %v4386_v26 = vld [vmem:[%s5516_s8] sm:$0xff]   ;;  %s4919_s6 = smov 32   ;;  %s4920_s12 = smov 16  }
 0x170   : > { %v1031_v18 = vld [vmem:[%s6283_s11] sm:$0xff]  ;;  %v4384_v21 = vld [vmem:[%s5510_s0 + $0x38] sm:$0xff]   ;;  %v4387_v27 = vld [vmem:[%s5516_s8 + $0x8] sm:$0xff]   ;;  %s6285_s0 = sld [smem:[#allocation49_spill]]  ;;  %s6290_s11 = sld [smem:[#allocation55_spill]] }
 0x171   : > { %3931 = vmatpush3.bf16.msra.mxu1 %v4372_v5  ;;  %v5615_v16 = vld [vmem:[#allocation2] sm:$0xff]  ;;  %v5617_v17 = vld [vmem:[#allocation2 + $0x8] sm:$0xff]  ;;  %v4390_v30 = vld [vmem:[%s5516_s8 + $0x20] sm:$0xff]  }
 0x172   : > { %3911 = vmatpush3.bf16.msra.mxu0 %v4373_v6  ;;  %3932 = vmatprep.subr.bf16.mxu1 %v4912_v3  ;;  %v4383_v20 = vld [vmem:[%s5504_s4 + $0x30] sm:$0xff]   ;;  %v4385_v22 = vld [vmem:[%s5504_s4 + $0x38] sm:$0xff]   ;;  %v1033_v23 = vadd.f32 %v1031_v18, %v5615_v16  ;;  %v1034_v24 = vadd.f32 %v1032_v19, %v5617_v17  ;;  %v4391_v31 = vld [vmem:[%s5516_s8 + $0x28] sm:$0xff]   ;;  %s6288_s18 = scalar_lea.vmem %s6287_s27, %s5534_s15  ;;  %v1036_v48 = vpack.c.bf16 %v5617_v17, %v5615_v16  ;;  %s6292_s4 = sld [smem:[#allocation56_spill]] }
 0x173   : > { %3912 = vmatprep.subr.bf16.mxu0 %v4912_v3  ;;  %v4388_v28 = vld [vmem:[%s5516_s8 + $0x10] sm:$0xff]   ;;  %v4389_v29 = vld [vmem:[%s5516_s8 + $0x18] sm:$0xff]  }
 0x174   : > { %v1035_v25 = vpack.c.bf16 %v1034_v24, %v1033_v23  ;;  %v4392_v32 = vld [vmem:[%s5516_s8 + $0x30] sm:$0xff]   ;;  %v4393_v34 = vld [vmem:[%s5516_s8 + $0x38] sm:$0xff]   ;;  %s4914_s8 = smov 96  }
 0x175   : > { %3933 = vmatpush3.bf16.msra.mxu1 %v4374_v7  ;;  %v3708_v35 = vld [vmem:[%s6288_s18] ss:$0 sm:$0xff] }
 0x176   : > { %3913 = vmatpush3.bf16.msra.mxu0 %v4375_v8  ;;  %3934 = vmatprep.subr.bf16.mxu1 %v4912_v3  ;;  %s6286_s24 = scalar_lea.vmem %s6285_s0, %s5534_s15  ;;  %s6291_s23 = scalar_lea.vmem %s6290_s11, %s5534_s15 }
 0x177   : > { %3914 = vmatprep.subr.bf16.mxu0 %v4912_v3  ;;  %v3699_v33 = vld [vmem:[%s6286_s24] ss:$0 sm:$0xff] }
 0x178   : > { %s6293_s0 = scalar_lea.vmem %s6292_s4, %s5534_s15 }
 0x179   : > { %3935 = vmatpush3.bf16.msra.mxu1 %v4376_v9 }
 0x17a   : > { %3915 = vmatpush3.bf16.msra.mxu0 %v4377_v10  ;;  %3936 = vmatprep.subr.bf16.mxu1 %v4912_v3 }
 0x17b   : > { %3916 = vmatprep.subr.bf16.mxu0 %v4912_v3 }
 0x17d   : > { %3937 = vmatpush3.bf16.msra.mxu1 %v4378_v11 }
 0x17e   : > { %3917 = vmatpush3.bf16.msra.mxu0 %v4379_v12  ;;  %3938 = vmatprep.subr.bf16.mxu1 %v4912_v3 }
 0x17f   : > { %3918 = vmatprep.subr.bf16.mxu0 %v4912_v3 }
 0x181   : > { %3939 = vmatpush3.bf16.msra.mxu1 %v4380_v13 }
 0x182   : > { %3919 = vmatpush3.bf16.msra.mxu0 %v4381_v14  ;;  %3940 = vmatprep.subr.bf16.mxu1 %v4912_v3 }
 0x183   : > { %3920 = vmatprep.subr.bf16.mxu0 %v4912_v3 }
 0x185   : > { %3941 = vmatpush3.bf16.msra.mxu1 %v4382_v15 }
 0x186   : > { %3921 = vmatpush3.bf16.msra.mxu0 %v4383_v20  ;;  %3942 = vmatprep.subr.bf16.mxu1 %v4912_v3 }
 0x187   : > { %3922 = vmatprep.subr.bf16.mxu0 %v4912_v3 }
 0x189   : > { %3943 = vmatpush3.bf16.msra.mxu1 %v4384_v21 }
 0x18a   : > { %3923 = vmatpush3.bf16.msra.mxu0 %v4385_v22  ;;  %3968 = vmatprep.subr.bf16.mxu1 %v4912_v3 }
 0x18b   : > { %3948 = vmatprep.subr.bf16.mxu0 %v4912_v3 }
 0x18c   : > { %3945 = vmatmul.mubr.bf16.vlgmr.msra.gmra.mrb[0].mxu1 %v1035_v25 }
 0x18d   : > { %3925 = vmatmul.mubr.bf16.vlgmr.msra.gmra.mrb[0].mxu0 %v1035_v25  ;;  %3970 = vmatprep.mubr.msk.bf16.mxu1 %vm4913_vm0, %v4912_v3 }
 0x18e   : > { %3964 = vmatprep.mubr.msk.bf16.mxu0 %vm4913_vm0, %v4912_v3  ;;  %3949 = vmatpush3.bf16.msra.mxu0 %v4386_v26 }
 0x18f   : > { %3950 = vmatprep.subr.bf16.mxu0 %v4912_v3 }
 0x192   : > { %3951 = vmatpush3.bf16.msra.mxu0 %v4387_v27 }
 0x193   : > { %3952 = vmatprep.subr.bf16.mxu0 %v4912_v3 }
 0x196   : > { %3953 = vmatpush3.bf16.msra.mxu0 %v4388_v28 }
 0x197   : > { %3954 = vmatprep.subr.bf16.mxu0 %v4912_v3 }
 0x19a   : > { %3955 = vmatpush3.bf16.msra.mxu0 %v4389_v29 }
 0x19b   : > { %3956 = vmatprep.subr.bf16.mxu0 %v4912_v3 }
 0x19e   : > { %3957 = vmatpush3.bf16.msra.mxu0 %v4390_v30 }
 0x19f   : > { %3958 = vmatprep.subr.bf16.mxu0 %v4912_v3 }
 0x1a2   : > { %3959 = vmatpush3.bf16.msra.mxu0 %v4391_v31 }
 0x1a3   : > { %3960 = vmatprep.subr.bf16.mxu0 %v4912_v3 }
 0x1a6   : > { %3961 = vmatpush3.bf16.msra.mxu0 %v4392_v32 }
 0x1a7   : > { %3962 = vmatprep.subr.bf16.mxu0 %v4912_v3 }
 0x1aa   : > { %3963 = vmatpush3.bf16.msra.mxu0 %v4393_v34 }
 0x1ab   : > { %3992 = vmatprep.subr.bf16.mxu0 %v4912_v3 }
 0x1ad   : > { %3965 = vmatmul.mubr.bf16.vlgmr.msra.gmra.mrb[4].mxu0 %v1036_v48 }
 0x1ae   : > { %3994 = vmatprep.mubr.msk.bf16.mxu0 %vm4913_vm0, %v4912_v3 }
 0x25f   : > { %v1254_v36 = vpop.f32.mrb[0].mxu1 }
 0x260   : > { %v1142_v37 = vpop.f32.mrb[0].mxu0  ;;  %v3946_v38 = vpop.f32.mrb[1].mxu1  ;;  %v1255_v42 = vadd.f32 %v3708_v35, %v1254_v36 }
 0x261   : > { %v1143_v39 = vadd.f32 %v3699_v33, %v1142_v37  ;;  %v3926_v40 = vpop.f32.mrb[1].mxu0  ;;  %v1257_v41 = vpop.f32.mrb[2].mxu1 }
 0x262   : > { %v1258_v43 = vadd.f32 %v3708_v35, %v1257_v41  ;;  %v1145_v44 = vpop.f32.mrb[2].mxu0  ;;  %v3947_v45 = vpop.f32.mrb[3].mxu1 }
 0x263   : > { %v1146_v46 = vadd.f32 %v3699_v33, %v1145_v44  ;;  %v3927_v47 = vpop.f32.mrb[3].mxu0 }
 0x264   : > { %v4275_v49 = vpack.i.bf16 %v1258_v43, %v1255_v42  ;;  %v1469_v50 = vpack.c.bf16 %v1258_v43, %v1255_v42 }
 0x265   : > { %v4280_v51 = vpack.i.bf16 %v1146_v46, %v1143_v39  ;;  %v1417_v52 = vpack.c.bf16 %v1146_v46, %v1143_v39 }
 0x266   : > { %4276 = vrot.lane.b32.xlu1 %v4275_v49, %s4914_s8  ;;  %4266 = vrot.lane.b32.xlu0 %v4275_v49, %s4915_s1  ;;  %v1534_v53 = vsel %vm1529_vm1, %v1469_v50, 0 }
 0x267   : > { %3969 = vmatpush3.bf16.xpose.msra.mxu1 %v1534_v53 }
 0x268   : > { %3974 = vmatprep.subr.bf16.mxu1 %v4912_v3 }
 0x26a   : > { %4281 = vrot.lane.b32.xlu1 %v4280_v51, %s4914_s8  ;;  %4271 = vrot.lane.b32.xlu0 %v4280_v51, %s4915_s1 }
 0x26e   : > { %4291 = vrot.lane.b32.xlu1 %v4275_v49, %s4916_s7  ;;  %4286 = vrot.lane.b32.xlu0 %v4275_v49, %s4917_s25 }
 0x26f   : > { %3971 = vmatmul.mubr.msk.bf16.vlgmr.msra.gmra.mrb[4].mxu1 %vm1529_vm1, %v1417_v52 }
 0x270   : > { %3976 = vmatprep.mubr.msk.bf16.mxu1 %vm4913_vm0, %v4912_v3 }
 0x272   : > { %4301 = vrot.lane.b32.xlu1 %v4275_v49, %s4918_s10  ;;  %4296 = vrot.lane.b32.xlu0 %v4280_v51, %s4917_s25 }
 0x276   : > { %4311 = vrot.lane.b32.xlu1 %v4275_v49, %s4919_s6  ;;  %4306 = vrot.lane.b32.xlu0 %v4280_v51, %s4916_s7 }
 0x27a   : > { %4321 = vrot.lane.b32.xlu1 %v4275_v49, %s4920_s12  ;;  %4316 = vrot.lane.b32.xlu0 %v4280_v51, %s4918_s10 }
 0x27e   : > { %4331 = vrot.lane.b32.xlu1 %v4280_v51, %s4920_s12  ;;  %4326 = vrot.lane.b32.xlu0 %v4280_v51, %s4919_s6 }
 0x2d8   : > { %v4277_v54 = vpop.permute.xlu1 %4276  ;;  %v4267_v55 = vpop.permute.xlu0 %4266 }
 0x2d9   : > { %v4269_v56 = vunpack.i.h.bf16 %v4267_v55  ;;  %v4268_v57 = vunpack.i.l.bf16 %v4267_v55  ;;  %v4279_v61 = vunpack.i.h.bf16 %v4277_v54  ;;  %v4278_v62 = vunpack.i.l.bf16 %v4277_v54  ;;  %v3717_v54 = vld [vmem:[%s997_s29] ss:$0 sm:$0xff]  ;;  %v1366_v55 = vpop.f32.mrb[4].mxu0 }
 0x2db   : > { %v1470_v58 = vpack.c.bf16 %v4269_v56, %v4268_v57  ;;  %v1471_v7 = vpack.c.bf16 %v4279_v61, %v4278_v62  ;;  %v1367_v56 = vadd.f32 %v3717_v54, %v1366_v55  ;;  %v3966_v57 = vpop.f32.mrb[5].mxu0 }
 0x2dc   : > { %v4282_v59 = vpop.permute.xlu1 %4281  ;;  %v4272_v60 = vpop.permute.xlu0 %4271 }
 0x2dd   : > { %v1581_v63 = vsel %vm1529_vm1, %v1470_v58, 0  ;;  %v4274_v0 = vunpack.i.h.bf16 %v4272_v60  ;;  %v4273_v1 = vunpack.i.l.bf16 %v4272_v60  ;;  %v1628_v14 = vsel %vm1529_vm1, %v1471_v7, 0  ;;  %v1369_v58 = vpop.f32.mrb[6].mxu0 }
 0x2de   : > { %3975 = vmatpush3.bf16.xpose.msra.mxu1 %v1581_v63  ;;  %v4284_v16 = vunpack.i.h.bf16 %v4282_v59  ;;  %v4283_v17 = vunpack.i.l.bf16 %v4282_v59  ;;  %v1370_v59 = vadd.f32 %v3717_v54, %v1369_v58  ;;  %v3967_v60 = vpop.f32.mrb[7].mxu0 }
 0x2df   : > { %3980 = vmatprep.subr.bf16.mxu1 %v4912_v3  ;;  %v1418_v9 = vpack.c.bf16 %v4274_v0, %v4273_v1 }
 0x2e0   : > { %v4292_v2 = vpop.permute.xlu1 %4291  ;;  %v4287_v4 = vpop.permute.xlu0 %4286  ;;  %v1419_v27 = vpack.c.bf16 %v4284_v16, %v4283_v17  ;;  %v1521_v61 = vpack.c.bf16 %v1370_v59, %v1367_v56  ;;  %v5727_v62 = vpack.i.bf16 %v1370_v59, %v1367_v56 }
 0x2e1   : > { %v4294_v5 = vunpack.i.h.bf16 %v4292_v2  ;;  %v4293_v6 = vunpack.i.l.bf16 %v4292_v2  ;;  %v4289_v12 = vunpack.i.h.bf16 %v4287_v4  ;;  %v4288_v13 = vunpack.i.l.bf16 %v4287_v4 }
 0x2e3   : > { %v1473_v8 = vpack.c.bf16 %v4294_v5, %v4293_v6  ;;  %v1472_v24 = vpack.c.bf16 %v4289_v12, %v4288_v13 }
 0x2e4   : > { %v4302_v10 = vpop.permute.xlu1 %4301  ;;  %v4297_v11 = vpop.permute.xlu0 %4296 }
 0x2e5   : > { %3977 = vmatmul.mubr.msk.bf16.vlgmr.msra.gmra.mrb[8].mxu1 %vm1529_vm1, %v1418_v9  ;;  %v1722_v15 = vsel %vm1529_vm1, %v1473_v8, 0  ;;  %v4304_v29 = vunpack.i.h.bf16 %v4302_v10  ;;  %v4303_v30 = vunpack.i.l.bf16 %v4302_v10  ;;  %v1675_v31 = vsel %vm1529_vm1, %v1472_v24, 0 }
 0x2e6   : > { %3981 = vmatpush3.bf16.xpose.msra.mxu1 %v1628_v14  ;;  %3993 = vmatpush3.bf16.xpose.msra.mxu0 %v1722_v15  ;;  %v4299_v33 = vunpack.i.h.bf16 %v4297_v11  ;;  %v4298_v34 = vunpack.i.l.bf16 %v4297_v11 }
 0x2e7   : > { %3982 = vmatprep.mubr.msk.bf16.mxu1 %vm4913_vm0, %v4912_v3  ;;  %3986 = vmatprep.subr.bf16.mxu1 %v4912_v3  ;;  %v1474_v38 = vpack.c.bf16 %v4304_v29, %v4303_v30 }
 0x2e8   : > { %v4312_v18 = vpop.permute.xlu1 %4311  ;;  %v4307_v19 = vpop.permute.xlu0 %4306  ;;  %4004 = vmatprep.subr.bf16.mxu0 %v4912_v3  ;;  %v1420_v41 = vpack.c.bf16 %v4299_v33, %v4298_v34 }
 0x2e9   : > { %v4314_v20 = vunpack.i.h.bf16 %v4312_v18  ;;  %v4313_v21 = vunpack.i.l.bf16 %v4312_v18  ;;  %v4309_v22 = vunpack.i.h.bf16 %v4307_v19  ;;  %v4308_v23 = vunpack.i.l.bf16 %v4307_v19 }
 0x2ea   : > { %v1769_v44 = vsel %vm1529_vm1, %v1474_v38, 0 }
 0x2eb   : > { %v1475_v25 = vpack.c.bf16 %v4314_v20, %v4313_v21  ;;  %v1421_v26 = vpack.c.bf16 %v4309_v22, %v4308_v23 }
 0x2ec   : > { %v4317_v28 = vpop.permute.xlu0 %4316  ;;  %v4322_v39 = vpop.permute.xlu1 %4321 }
 0x2ed   : > { %3983 = vmatmul.mubr.msk.bf16.vlgmr.msra.gmra.mrb[12].mxu1 %vm1529_vm1, %v1419_v27  ;;  %3995 = vmatmul.mubr.msk.bf16.vlgmr.msra.gmra.mrb[8].mxu0 %vm1529_vm1, %v1421_v26  ;;  %v1816_v32 = vsel %vm1529_vm1, %v1475_v25, 0  ;;  %v4324_v42 = vunpack.i.h.bf16 %v4322_v39  ;;  %v4323_v43 = vunpack.i.l.bf16 %v4322_v39  ;;  %v4319_v45 = vunpack.i.h.bf16 %v4317_v28 }
 0x2ee   : > { %3987 = vmatpush3.bf16.xpose.msra.mxu1 %v1675_v31  ;;  %4005 = vmatpush3.bf16.xpose.msra.mxu0 %v1816_v32  ;;  %v4318_v46 = vunpack.i.l.bf16 %v4317_v28 }
 0x2ef   : > { %3988 = vmatprep.mubr.msk.bf16.mxu1 %vm4913_vm0, %v4912_v3  ;;  %4006 = vmatprep.mubr.msk.bf16.mxu0 %vm4913_vm0, %v4912_v3  ;;  %v1476_v47 = vpack.c.bf16 %v4324_v42, %v4323_v43 }
 0x2f0   : > { %v4327_v35 = vpop.permute.xlu0 %4326  ;;  %3998 = vmatprep.subr.bf16.mxu1 %v4912_v3  ;;  %4016 = vmatprep.subr.bf16.mxu0 %v4912_v3  ;;  %v1422_v48 = vpack.c.bf16 %v4319_v45, %v4318_v46  ;;  %v4332_v49 = vpop.permute.xlu1 %4331 }
 0x2f1   : > { %v4329_v36 = vunpack.i.h.bf16 %v4327_v35  ;;  %v4328_v37 = vunpack.i.l.bf16 %v4327_v35  ;;  %v1863_v50 = vsel %vm1529_vm1, %v1476_v47, 0  ;;  %v4334_v51 = vunpack.i.h.bf16 %v4332_v49 }
 0x2f2   : > { %v4333_v52 = vunpack.i.l.bf16 %v4332_v49 }
 0x2f3   : > { %v1423_v40 = vpack.c.bf16 %v4329_v36, %v4328_v37 }
 0x2f4   : > { %v1424_v53 = vpack.c.bf16 %v4334_v51, %v4333_v52 }
 0x2f5   : > { %3989 = vmatmul.mubr.msk.bf16.vlgmr.msra.gmra.mrb[16].mxu1 %vm1529_vm1, %v1420_v41  ;;  %4007 = vmatmul.mubr.msk.bf16.vlgmr.msra.gmra.mrb[12].mxu0 %vm1529_vm1, %v1423_v40 }
 0x2f6   : > { %3999 = vmatpush3.bf16.xpose.msra.mxu1 %v1769_v44  ;;  %4000 = vmatprep.mubr.msk.bf16.mxu1 %vm4913_vm0, %v4912_v3 }
 0x2f7   : > { %4010 = vmatprep.subr.bf16.mxu1 %v4912_v3  ;;  %4018 = vmatprep.mubr.msk.bf16.mxu0 %vm4913_vm0, %v4912_v3 }
 0x2f8   : > { %4017 = vmatpush3.bf16.msra.mxu0 %v1521_v61 }
 0x2f9   : > { %4028 = vmatprep.subr.bf16.mxu0 %v4912_v3 }
 0x2fd   : > { %4001 = vmatmul.mubr.msk.bf16.vlgmr.msra.gmra.mrb[20].mxu1 %vm1529_vm1, %v1422_v48 }
 0x2fe   : > { %4011 = vmatpush3.bf16.xpose.msra.mxu1 %v1863_v50  ;;  %4012 = vmatprep.mubr.msk.bf16.mxu1 %vm4913_vm0, %v4912_v3 }
 0x2ff   : > { %4022 = vmatprep.subr.bf16.mxu1 %v4912_v3 }
 0x305   : > { %4013 = vmatmul.mubr.msk.bf16.vlgmr.msra.gmra.mrb[24].mxu1 %vm1529_vm1, %v1424_v53 }
 0x306   : > { %4024 = vmatprep.mubr.msk.bf16.mxu1 %vm4913_vm0, %v4912_v3 }
 0x342   : > { %v5730_v63 = vpop.f32.mrb[4].mxu1 }
 0x343   : > { %v3972_v0 = vpop.f32.mrb[5].mxu1  ;;  %v1906_v1 = vsel %vm1529_vm1, %v5730_v63, -inf }
 0x344   : > { %1907 = vmax.xlane.f32.xlu0 %v1906_v1  ;;  %v1573_v2 = vpop.f32.mrb[6].mxu1 }
 0x345   : > { %v3973_v4 = vpop.f32.mrb[7].mxu1  ;;  %v1909_v5 = vsel %vm1529_vm1, %v1573_v2, -inf }
 0x346   : > { %1910 = vmax.xlane.f32.xlu1 %v1909_v5 }
 0x3b8   : > { %v5735_v6 = vpop.f32.mrb[8].mxu1 }
 0x3b9   : > { %v3978_v7 = vpop.f32.mrb[9].mxu1  ;;  %v1912_v8 = vsel %vm1529_vm1, %v5735_v6, -inf }
 0x3ba   : > { %1913 = vmax.xlane.f32.xlu0 %v1912_v8  ;;  %v5739_v9 = vpop.f32.mrb[10].mxu1 }
 0x3bb   : > { %v3979_v10 = vpop.f32.mrb[11].mxu1  ;;  %v1915_v11 = vsel %vm1529_vm1, %v5739_v9, -inf }
 0x3be   : > { %1916 = vmax.xlane.f32.xlu0 %v1915_v11 }
 0x3c0   : > { %v5743_v12 = vpop.f32.mrb[12].mxu1  ;;  %v5745_v13 = vpop.f32.mrb[8].mxu0 }
 0x3c1   : > { %v3984_v14 = vpop.f32.mrb[13].mxu1  ;;  %v3996_v15 = vpop.f32.mrb[9].mxu0  ;;  %v1930_v16 = vsel %vm1529_vm1, %v5745_v13, -inf  ;;  %v1918_v22 = vsel %vm1529_vm1, %v5743_v12, -inf }
 0x3c2   : > { %v5749_v17 = vpop.f32.mrb[14].mxu1  ;;  %1931 = vmax.xlane.f32.xlu1 %v1930_v16  ;;  %v5751_v18 = vpop.f32.mrb[10].mxu0 }
 0x3c3   : > { %v3985_v19 = vpop.f32.mrb[15].mxu1  ;;  %v3997_v20 = vpop.f32.mrb[11].mxu0  ;;  %v1933_v21 = vsel %vm1529_vm1, %v5751_v18, -inf  ;;  %v1921_v23 = vsel %vm1529_vm1, %v5749_v17, -inf }
 0x3c4   : > { %1934 = vmax.xlane.f32.xlu0 %v1933_v21 }
 0x3c6   : > { %1919 = vmax.xlane.f32.xlu1 %v1918_v22 }
 0x3c8   : > { %v5759_v24 = vpop.f32.mrb[16].mxu1  ;;  %1922 = vmax.xlane.f32.xlu0 %v1921_v23  ;;  %v5761_v25 = vpop.f32.mrb[12].mxu0 }
 0x3c9   : > { %v3990_v26 = vpop.f32.mrb[17].mxu1  ;;  %v4008_v27 = vpop.f32.mrb[13].mxu0  ;;  %v1942_v28 = vsel %vm1529_vm1, %v5761_v25, -inf  ;;  %v1924_v34 = vsel %vm1529_vm1, %v5759_v24, -inf }
 0x3ca   : > { %v5765_v29 = vpop.f32.mrb[18].mxu1  ;;  %1943 = vmax.xlane.f32.xlu1 %v1942_v28  ;;  %v5767_v30 = vpop.f32.mrb[14].mxu0 }
 0x3cb   : > { %v3991_v31 = vpop.f32.mrb[19].mxu1  ;;  %v4009_v32 = vpop.f32.mrb[15].mxu0  ;;  %v1927_v33 = vsel %vm1529_vm1, %v5765_v29, -inf  ;;  %v1945_v35 = vsel %vm1529_vm1, %v5767_v30, -inf }
 0x3cc   : > { %1928 = vmax.xlane.f32.xlu0 %v1927_v33 }
 0x3ce   : > { %1925 = vmax.xlane.f32.xlu1 %v1924_v34 }
 0x3d0   : > { %v5775_v36 = vpop.f32.mrb[20].mxu1  ;;  %1946 = vmax.xlane.f32.xlu0 %v1945_v35 }
 0x3d1   : > { %v4002_v37 = vpop.f32.mrb[21].mxu1  ;;  %v1936_v49 = vsel %vm1529_vm1, %v5775_v36, -inf  ;;  %v1908_v53 = vpop.xlane.xlu0 %1907 }
 0x3d2   : > { %v5777_v38 = vpop.f32.mrb[22].mxu1  ;;  %v1954_v54 = vsub.f32 %v5730_v63, %v1908_v53 }
 0x3d3   : > { %v4003_v39 = vpop.f32.mrb[23].mxu1  ;;  %v1939_v40 = vsel %vm1529_vm1, %v5777_v38, -inf  ;;  %v1911_v46 = vpop.xlane.xlu1 %1910 }
 0x3d4   : > { %1940 = vmax.xlane.f32.xlu0 %v1939_v40  ;;  %v1955_v47 = vsub.f32 %v1573_v2, %v1911_v46  ;;  %v1970_v55 = vmul.f32 1.442695, %v1954_v54 }
 0x3d6   : > { %v1972_v48 = vmul.f32 1.442695, %v1955_v47 }
 0x3d8   : > { %v5781_v41 = vpop.f32.mrb[24].mxu1  ;;  %4442 = vpow2.f32 %v1972_v48 }
 0x3d9   : > { %v4014_v42 = vpop.f32.mrb[25].mxu1  ;;  %v1948_v50 = vsel %vm1529_vm1, %v5781_v41, -inf  ;;  %4444 = vpow2.f32 %v1970_v55 }
 0x3da   : > { %v5783_v43 = vpop.f32.mrb[26].mxu1 }
 0x3db   : > { %v4015_v44 = vpop.f32.mrb[27].mxu1  ;;  %v1951_v45 = vsel %vm1529_vm1, %v5783_v43, -inf }
 0x3dc   : > { %1952 = vmax.xlane.f32.xlu0 %v1951_v45 }
 0x3df   : > { %4336 = vrot.lane.b32.xlu1 %v5727_v62, %s4915_s1 }
 0x3e2   : > { %v5795_v51 = vpop.eup %4442 }
 0x3e3   : > { %v2005_v52 = vsel %vm1529_vm1, %v5795_v51, 0.0  ;;  %v5806_v56 = vpop.eup %4444 }
 0x3e4   : > { %v2002_v57 = vsel %vm1529_vm1, %v5806_v56, 0.0 }
 0x3f2   : > { %4341 = vrot.lane.b32.xlu0 %v5727_v62, %s4914_s8 }
 0x403   : > { %1937 = vmax.xlane.f32.xlu1 %v1936_v49 }
 0x407   : > { %1949 = vmax.xlane.f32.xlu1 %v1948_v50 }
 0x411   : > { %2006 = vadd.xlane.f32.xlu0 %v2005_v52 }
 0x418   : > { %4346 = vrot.lane.b32.xlu1 %v5727_v62, %s4917_s25  ;;  %s6298_s25 = sld [smem:[#allocation30_spill]] }
 0x41c   : > { %4351 = vrot.lane.b32.xlu1 %v5727_v62, %s4916_s7 }
 0x41e   : > { %p3796_p8 = scmp.ne.s32.totalorder %s6298_s25, 1 }
 0x420   : > { %4356 = vrot.lane.b32.xlu1 %v5727_v62, %s4918_s10 }
 0x444   : > { %2003 = vadd.xlane.f32.xlu1 %v2002_v57 }
 0x447   : > { %v1914_v58 = vpop.xlane.xlu0 %1913 }
 0x448   : > { %v1956_v59 = vsub.f32 %v5735_v6, %v1914_v58 }
 0x44a   : > { %v1974_v60 = vmul.f32 1.442695, %v1956_v59 }
 0x44b   : > { %v1917_v61 = vpop.xlane.xlu0 %1916 }
 0x44c   : > { %4446 = vpow2.f32 %v1974_v60  ;;  %v1957_v0 = vsub.f32 %v5739_v9, %v1917_v61 }
 0x44e   : > { %v1976_v1 = vmul.f32 1.442695, %v1957_v0 }
 0x44f   : > { %v1932_v2 = vpop.xlane.xlu1 %1931 }
 0x450   : > { %4448 = vpow2.f32 %v1976_v1  ;;  %v1962_v63 = vsub.f32 %v5745_v13, %v1932_v2 }
 0x451   : > { %v1935_v4 = vpop.xlane.xlu0 %1934 }
 0x452   : > { %v1986_v5 = vmul.f32 1.442695, %v1962_v63  ;;  %v1963_v7 = vsub.f32 %v5751_v18, %v1935_v4 }
 0x453   : > { %v1920_v8 = vpop.xlane.xlu1 %1919 }
 0x454   : > { %4450 = vpow2.f32 %v1986_v5  ;;  %v1988_v10 = vmul.f32 1.442695, %v1963_v7  ;;  %v1958_v11 = vsub.f32 %v5743_v12, %v1920_v8 }
 0x455   : > { %v1923_v6 = vpop.xlane.xlu0 %1922 }
 0x456   : > { %v5815_v14 = vpop.eup %4446  ;;  %4452 = vpow2.f32 %v1988_v10  ;;  %v1978_v15 = vmul.f32 1.442695, %v1958_v11  ;;  %v1959_v9 = vsub.f32 %v5749_v17, %v1923_v6 }
 0x457   : > { %v1944_v16 = vpop.xlane.xlu1 %1943  ;;  %v2008_v13 = vsel %vm1529_vm1, %v5815_v14, 0.0 }
 0x458   : > { %4454 = vpow2.f32 %v1978_v15  ;;  %v1980_v19 = vmul.f32 1.442695, %v1959_v9  ;;  %v1966_v18 = vsub.f32 %v5761_v25, %v1944_v16  ;;  %2009 = vadd.xlane.f32.xlu1 %v2008_v13 }
 0x459   : > { %v1929_v20 = vpop.xlane.xlu0 %1928 }
 0x45a   : > { %v5821_v21 = vpop.eup %4448  ;;  %4456 = vpow2.f32 %v1980_v19  ;;  %v1994_v12 = vmul.f32 1.442695, %v1966_v18  ;;  %v1961_v22 = vsub.f32 %v5765_v29, %v1929_v20 }
 0x45b   : > { %v1926_v23 = vpop.xlane.xlu1 %1925  ;;  %v2011_v17 = vsel %vm1529_vm1, %v5821_v21, 0.0 }
 0x45c   : > { %4458 = vpow2.f32 %v1994_v12  ;;  %v1960_v26 = vsub.f32 %v5759_v24, %v1926_v23  ;;  %2012 = vadd.xlane.f32.xlu0 %v2011_v17  ;;  %v1984_v32 = vmul.f32 1.442695, %v1961_v22 }
 0x45d   : > { %v1947_v27 = vpop.xlane.xlu0 %1946 }
 0x45e   : > { %v5827_v28 = vpop.eup %4450  ;;  %v1982_v25 = vmul.f32 1.442695, %v1960_v26  ;;  %v1967_v31 = vsub.f32 %v5767_v30, %v1947_v27 }
 0x45f   : > { %v4337_v33 = vpop.permute.xlu1 %4336  ;;  %v2026_v34 = vsel %vm1529_vm1, %v5827_v28, 0.0 }
 0x460   : > { %v5832_v29 = vpop.eup %4452  ;;  %4460 = vpow2.f32 %v1982_v25  ;;  %v1996_v35 = vmul.f32 1.442695, %v1967_v31  ;;  %v4339_v37 = vunpack.i.h.bf16 %v4337_v33  ;;  %v4338_v39 = vunpack.i.l.bf16 %v4337_v33  ;;  %2027 = vadd.xlane.f32.xlu1 %v2026_v34 }
 0x461   : > { %v1941_v24 = vpop.xlane.xlu0 %1940  ;;  %v2029_v40 = vsel %vm1529_vm1, %v5832_v29, 0.0 }
 0x462   : > { %v5836_v42 = vpop.eup %4454  ;;  %4462 = vpow2.f32 %v1996_v35  ;;  %v1522_v30 = vpack.c.bf16 %v4339_v37, %v4338_v39  ;;  %v1965_v44 = vsub.f32 %v5777_v38, %v1941_v24  ;;  %2030 = vadd.xlane.f32.xlu0 %v2029_v40 }
 0x463   : > { %v2014_v45 = vsel %vm1529_vm1, %v5836_v42, 0.0  ;;  %4464 = vpow2.f32 %v1984_v32 }
 0x464   : > { %v5841_v46 = vpop.eup %4456  ;;  %v1992_v47 = vmul.f32 1.442695, %v1965_v44  ;;  %2015 = vadd.xlane.f32.xlu1 %v2014_v45  ;;  %4023 = vmatpush3.bf16.msra.mxu1 %v1522_v30 }
 0x465   : > { %v2017_v48 = vsel %vm1529_vm1, %v5841_v46, 0.0  ;;  %4034 = vmatprep.subr.bf16.mxu1 %v4912_v3 }
 0x466   : > { %v5846_v49 = vpop.eup %4458  ;;  %2018 = vadd.xlane.f32.xlu0 %v2017_v48  ;;  %4466 = vpow2.f32 %v1992_v47 }
 0x467   : > { %v2038_v38 = vsel %vm1529_vm1, %v5846_v49, 0.0 }
 0x468   : > { %2039 = vadd.xlane.f32.xlu1 %v2038_v38 }
 0x469   : > { %v1953_v60 = vpop.xlane.xlu0 %1952 }
 0x46a   : > { %v5850_v50 = vpop.eup %4460  ;;  %v1969_v1 = vsub.f32 %v5783_v43, %v1953_v60 }
 0x46b   : > { %v2020_v52 = vsel %vm1529_vm1, %v5850_v50, 0.0 }
 0x46c   : > { %v5854_v53 = vpop.eup %4462  ;;  %2021 = vadd.xlane.f32.xlu1 %v2020_v52  ;;  %v2000_v5 = vmul.f32 1.442695, %v1969_v1 }
 0x46d   : > { %v2041_v54 = vsel %vm1529_vm1, %v5854_v53, 0.0  ;;  %v5858_v55 = vpop.eup %4464  ;;  %v4342_v9 = vpop.permute.xlu0 %4341 }
 0x46e   : > { %2042 = vadd.xlane.f32.xlu0 %v2041_v54  ;;  %v2023_v57 = vsel %vm1529_vm1, %v5858_v55, 0.0  ;;  %v4344_v12 = vunpack.i.h.bf16 %v4342_v9  ;;  %v4343_v22 = vunpack.i.l.bf16 %v4342_v9 }
 0x470   : > { %v5862_v58 = vpop.eup %4466  ;;  %v1523_v27 = vpack.c.bf16 %v4344_v12, %v4343_v22  ;;  %v4394_v22 = vld [vmem:[%s5518_s13] sm:$0xff]  }
 0x471   : > { %v2035_v59 = vsel %vm1529_vm1, %v5862_v58, 0.0 }
 0x472   : > { %2024 = vadd.xlane.f32.xlu0 %v2023_v57 }
 0x476   : > { %2036 = vadd.xlane.f32.xlu0 %v2035_v59 }
 0x490   : > { %v1938_v61 = vpop.xlane.xlu1 %1937 }
 0x491   : > { %v1964_v0 = vsub.f32 %v5775_v36, %v1938_v61 }
 0x493   : > { %v1990_v2 = vmul.f32 1.442695, %v1964_v0 }
 0x494   : > { %v1950_v63 = vpop.xlane.xlu1 %1949 }
 0x495   : > { %4468 = vpow2.f32 %v1990_v2  ;;  %v1968_v4 = vsub.f32 %v5781_v41, %v1950_v63 }
 0x497   : > { %v1998_v7 = vmul.f32 1.442695, %v1968_v4 }
 0x498   : > { %v4347_v6 = vpop.permute.xlu1 %4346 }
 0x499   : > { %4470 = vpow2.f32 %v1998_v7  ;;  %v4349_v35 = vunpack.i.h.bf16 %v4347_v6  ;;  %v4348_v37 = vunpack.i.l.bf16 %v4347_v6 }
 0x49a   : > { %4472 = vpow2.f32 %v2000_v5 }
 0x49b   : > { %v1524_v44 = vpack.c.bf16 %v4349_v35, %v4348_v37 }
 0x49c   : > { %v4352_v15 = vpop.permute.xlu1 %4351 }
 0x49d   : > { %v4353_v52 = vunpack.i.l.bf16 %v4352_v15 }
 0x49e   : > { %v2007_v16 = vpop.xlane.xlu0 %2006 }
 0x49f   : > { %v5869_v8 = vpop.eup %4468  ;;  %4474 = vrcp.f32 %v2007_v16 }
 0x4a0   : > { %v2032_v10 = vsel %vm1529_vm1, %v5869_v8, 0.0  ;;  %v5885_v13 = vpop.permute.xlu1 %4356 }
 0x4a1   : > { %2033 = vadd.xlane.f32.xlu1 %v2032_v10  ;;  %v4359_v4 = vunpack.i.h.bf16 %v5885_v13  ;;  %v4358_v5 = vunpack.i.l.bf16 %v5885_v13 }
 0x4a3   : > { %v5873_v11 = vpop.eup %4470 }
 0x4a4   : > { %v2044_v36 = vsel %vm1529_vm1, %v5873_v11, 0.0  ;;  %v5877_v43 = vpop.eup %4472 }
 0x4a5   : > { %2045 = vadd.xlane.f32.xlu0 %v2044_v36  ;;  %v2047_v41 = vsel %vm1529_vm1, %v5877_v43, 0.0  ;;  %v1526_v36 = vpack.c.bf16 %v4359_v4, %v4358_v5 }
 0x4a9   : > { %2048 = vadd.xlane.f32.xlu0 %v2047_v41  ;;  %v4475_v18 = vpop.eup %4474 }
 0x4aa   : > { %v2067_v23 = vmul.f32 %v4475_v18, %v5795_v51 }
 0x4b2   : > { %4361 = vrot.lane.b32.xlu1 %v5727_v62, %s4919_s6 }
 0x4bf   : > { %4366 = vrot.lane.b32.xlu0 %v5727_v62, %s4920_s12 }
 0x4d1   : > { %v2004_v19 = vpop.xlane.xlu1 %2003 }
 0x4d2   : > { %4476 = vrcp.f32 %v2004_v19 }
 0x4dc   : > { %v4477_v20 = vpop.eup %4476 }
 0x4dd   : > { %v2066_v17 = vmul.f32 %v4477_v20, %v5806_v56 }
 0x4df   : > { %v2082_v26 = vpack.c.bf16 %v2067_v23, %v2066_v17 }
 0x4e1   : > { %4019 = vmatmul.mubr.msk.bf16.vlgmr.msra.gmra.mrb[16].mxu0 %vm1529_vm1, %v2082_v26 }
 0x4e2   : > { %4029 = vmatpush3.bf16.msra.mxu0 %v1523_v27  ;;  %4030 = vmatprep.mubr.msk.bf16.mxu0 %vm4913_vm0, %v4912_v3 }
 0x4e3   : > { %4040 = vmatprep.subr.bf16.mxu0 %v4912_v3 }
 0x4e5   : > { %v2010_v62 = vpop.xlane.xlu1 %2009 }
 0x4e6   : > { %4478 = vrcp.f32 %v2010_v62 }
 0x4e9   : > { %v2013_v25 = vpop.xlane.xlu0 %2012 }
 0x4ea   : > { %4480 = vrcp.f32 %v2013_v25 }
 0x4ed   : > { %v2028_v31 = vpop.xlane.xlu1 %2027 }
 0x4ef   : > { %v2031_v32 = vpop.xlane.xlu0 %2030 }
 0x4f0   : > { %v4479_v51 = vpop.eup %4478 }
 0x4f1   : > { %v2016_v33 = vpop.xlane.xlu1 %2015  ;;  %v2068_v39 = vmul.f32 %v4479_v51, %v5815_v14  ;;  %v4354_v14 = vunpack.i.h.bf16 %v4352_v15 }
 0x4f2   : > { %4482 = vrcp.f32 %v2016_v33 }
 0x4f3   : > { %v2019_v56 = vpop.xlane.xlu0 %2018  ;;  %v1525_v61 = vpack.c.bf16 %v4354_v14, %v4353_v52  ;;  %v4397_v52 = vld [vmem:[%s5518_s13 + $0x20] sm:$0xff]  }
 0x4f4   : > { %v4481_v34 = vpop.eup %4480  ;;  %4484 = vrcp.f32 %v2019_v56  ;;  %v4395_v56 = vld [vmem:[%s5518_s13 + $0x8] sm:$0xff]  }
 0x4f5   : > { %v2069_v24 = vmul.f32 %v4481_v34, %v5821_v21  ;;  %v2040_v40 = vpop.xlane.xlu1 %2039  ;;  %4486 = vrcp.f32 %v2031_v32 }
 0x4f6   : > { %4488 = vrcp.f32 %v2028_v31 }
 0x4f7   : > { %v2083_v30 = vpack.c.bf16 %v2069_v24, %v2068_v39  ;;  %v4396_v39 = vld [vmem:[%s5518_s13 + $0x10] sm:$0xff]  }
 0x4f9   : > { %4025 = vmatmul.mubr.msk.bf16.vlgmr.msra.gmra.mrb[28].mxu1 %vm1529_vm1, %v2083_v30  ;;  %v2022_v45 = vpop.xlane.xlu1 %2021 }
 0x4fa   : > { %4035 = vmatpush3.bf16.msra.mxu1 %v1524_v44  ;;  %4036 = vmatprep.mubr.msk.bf16.mxu1 %vm4913_vm0, %v4912_v3  ;;  %4490 = vrcp.f32 %v2022_v45  ;;  %v4398_v44 = vld [vmem:[%s5518_s13 + $0x18] sm:$0xff]  }
 0x4fb   : > { %v2043_v47 = vpop.xlane.xlu0 %2042  ;;  %4046 = vmatprep.subr.bf16.mxu1 %v4912_v3 }
 0x4fc   : > { %v4483_v48 = vpop.eup %4482 }
 0x4fd   : > { %v2070_v21 = vmul.f32 %v4483_v48, %v5836_v42 }
 0x4fe   : > { %v4485_v38 = vpop.eup %4484 }
 0x4ff   : > { %v2071_v54 = vmul.f32 %v4485_v38, %v5841_v46  ;;  %v2025_v57 = vpop.xlane.xlu0 %2024  ;;  %v4487_v60 = vpop.eup %4486 }
 0x500   : > { %4492 = vrcp.f32 %v2025_v57  ;;  %v4489_v0 = vpop.eup %4488  ;;  %v2075_v1 = vmul.f32 %v4487_v60, %v5832_v29 }
 0x501   : > { %v2084_v59 = vpack.c.bf16 %v2071_v54, %v2070_v21  ;;  %v2074_v42 = vmul.f32 %v4489_v0, %v5827_v28  ;;  %4494 = vrcp.f32 %v2043_v47 }
 0x502   : > { %4496 = vrcp.f32 %v2040_v40 }
 0x503   : > { %4031 = vmatmul.mubr.msk.bf16.vlgmr.msra.gmra.mrb[20].mxu0 %vm1529_vm1, %v2084_v59  ;;  %v2086_v46 = vpack.c.bf16 %v2075_v1, %v2074_v42  ;;  %v2037_v28 = vpop.xlane.xlu0 %2036 }
 0x504   : > { %4041 = vmatpush3.bf16.msra.mxu0 %v1525_v61  ;;  %4042 = vmatprep.mubr.msk.bf16.mxu0 %vm4913_vm0, %v4912_v3  ;;  %v4491_v2 = vpop.eup %4490  ;;  %4498 = vrcp.f32 %v2037_v28  ;;  %v4400_v61 = vld [vmem:[%s5518_s13 + $0x30] sm:$0xff]  }
 0x505   : > { %4052 = vmatprep.subr.bf16.mxu0 %v4912_v3  ;;  %v2072_v7 = vmul.f32 %v4491_v2, %v5850_v50 }
 0x50a   : > { %v4493_v63 = vpop.eup %4492 }
 0x50b   : > { %v2073_v10 = vmul.f32 %v4493_v63, %v5858_v55  ;;  %4043 = vmatmul.mubr.msk.bf16.vlgmr.msra.gmra.mrb[24].mxu0 %vm1529_vm1, %v2086_v46  ;;  %v4495_v55 = vpop.eup %4494  ;;  %v4399_v63 = vld [vmem:[%s5518_s13 + $0x28] sm:$0xff]  }
 0x50c   : > { %4054 = vmatprep.mubr.msk.bf16.mxu0 %vm4913_vm0, %v4912_v3  ;;  %v4497_v15 = vpop.eup %4496  ;;  %v2079_v13 = vmul.f32 %v4495_v55, %v5854_v53 }
 0x50d   : > { %v2085_v29 = vpack.c.bf16 %v2073_v10, %v2072_v7  ;;  %v2078_v18 = vmul.f32 %v4497_v15, %v5846_v49 }
 0x50e   : > { %v4499_v12 = vpop.eup %4498 }
 0x50f   : > { %4037 = vmatmul.mubr.msk.bf16.vlgmr.msra.gmra.mrb[32].mxu1 %vm1529_vm1, %v2085_v29  ;;  %v2088_v23 = vpack.c.bf16 %v2079_v13, %v2078_v18  ;;  %v2077_v26 = vmul.f32 %v4499_v12, %v5862_v58 }
 0x510   : > { %4047 = vmatpush3.bf16.msra.mxu1 %v1526_v36  ;;  %4048 = vmatprep.mubr.msk.bf16.mxu1 %vm4913_vm0, %v4912_v3 }
 0x511   : > { %4058 = vmatprep.subr.bf16.mxu1 %v4912_v3 }
 0x52e   : > { %v2034_v50 = vpop.xlane.xlu1 %2033 }
 0x52f   : > { %4500 = vrcp.f32 %v2034_v50 }
 0x532   : > { %v4362_v41 = vpop.permute.xlu1 %4361  ;;  %v2046_v6 = vpop.xlane.xlu0 %2045 }
 0x533   : > { %v4364_v9 = vunpack.i.h.bf16 %v4362_v41  ;;  %v4363_v16 = vunpack.i.l.bf16 %v4362_v41  ;;  %4502 = vrcp.f32 %v2046_v6  ;;  %v4401_v6 = vld [vmem:[%s5518_s13 + $0x38] sm:$0xff]  }
 0x535   : > { %v1527_v19 = vpack.c.bf16 %v4364_v9, %v4363_v16 }
 0x536   : > { %v2049_v20 = vpop.xlane.xlu0 %2048 }
 0x537   : > { %4504 = vrcp.f32 %v2049_v20  ;;  %4053 = vmatpush3.bf16.msra.mxu0 %v1527_v19 }
 0x538   : > { %4064 = vmatprep.subr.bf16.mxu0 %v4912_v3 }
 0x539   : > { %v4501_v17 = vpop.eup %4500 }
 0x53a   : > { %v2076_v27 = vmul.f32 %v4501_v17, %v5869_v8  ;;  %v4367_v62 = vpop.permute.xlu0 %4366  ;;  %4055 = vmatmul.mubr.msk.bf16.vlgmr.msra.gmra.mrb[28].mxu0 %vm1529_vm1, %v2088_v23 }
 0x53b   : > { %v4369_v53 = vunpack.i.h.bf16 %v4367_v62  ;;  %v4368_v25 = vunpack.i.l.bf16 %v4367_v62  ;;  %4065 = vmatpush3.bf16.msra.mxu0 %v4394_v22  ;;  %4066 = vmatprep.mubr.msk.bf16.mxu0 %vm4913_vm0, %v4912_v3 }
 0x53c   : > { %v2087_v49 = vpack.c.bf16 %v2077_v26, %v2076_v27  ;;  %4076 = vmatprep.subr.bf16.mxu0 %v4912_v3 }
 0x53d   : > { %v1528_v31 = vpack.c.bf16 %v4369_v53, %v4368_v25  ;;  %v4503_v32 = vpop.eup %4502 }
 0x53e   : > { %4049 = vmatmul.mubr.msk.bf16.vlgmr.msra.gmra.mrb[36].mxu1 %vm1529_vm1, %v2087_v49  ;;  %v2080_v8 = vmul.f32 %v4503_v32, %v5873_v11 }
 0x53f   : > { %4059 = vmatpush3.bf16.msra.mxu1 %v1528_v31  ;;  %4060 = vmatprep.mubr.msk.bf16.mxu1 %vm4913_vm0, %v4912_v3 }
 0x540   : > { %4070 = vmatprep.subr.bf16.mxu1 %v4912_v3 }
 0x541   : > { %v4505_v58 = vpop.eup %4504 }
 0x542   : > { %v2081_v33 = vmul.f32 %v4505_v58, %v5877_v43 }
 0x544   : > { %v2089_v51 = vpack.c.bf16 %v2081_v33, %v2080_v8 }
 0x546   : > { %4061 = vmatmul.mubr.msk.bf16.vlgmr.msra.gmra.mrb[40].mxu1 %vm1529_vm1, %v2089_v51 }
 0x547   : > { %4072 = vmatprep.mubr.msk.bf16.mxu1 %vm4913_vm0, %v4912_v3  ;;  %4071 = vmatpush3.bf16.msra.mxu1 %v4395_v56 }
 0x548   : > { %4082 = vmatprep.subr.bf16.mxu1 %v4912_v3 }
 0x5b4   : > { %v2127_v34 = vpop.f32.mrb[16].mxu0 }
 0x5b5   : > { %v4020_v35 = vpop.f32.mrb[17].mxu0 }
 0x5b6   : > { %v2130_v37 = vpop.f32.mrb[18].mxu0 }
 0x5b7   : > { %v2442_v24 = vpack.c.bf16 %v2130_v37, %v2127_v34  ;;  %v4021_v40 = vpop.f32.mrb[19].mxu0 }
 0x5b9   : > { %4067 = vmatmul.mubr.msk.bf16.vlgmr.msra.gmra.mrb[32].mxu0 %vm1529_vm1, %v2442_v24 }
 0x5ba   : > { %4077 = vmatpush3.bf16.msra.mxu0 %v4396_v39  ;;  %4078 = vmatprep.mubr.msk.bf16.mxu0 %vm4913_vm0, %v4912_v3 }
 0x5bb   : > { %4088 = vmatprep.subr.bf16.mxu0 %v4912_v3 }
 0x5cc   : > { %v2171_v11 = vpop.f32.mrb[28].mxu1 }
 0x5cd   : > { %v4026_v43 = vpop.f32.mrb[29].mxu1 }
 0x5ce   : > { %v2174_v30 = vpop.f32.mrb[30].mxu1 }
 0x5cf   : > { %v2443_v45 = vpack.c.bf16 %v2174_v30, %v2171_v11  ;;  %v4027_v47 = vpop.f32.mrb[31].mxu1 }
 0x5d1   : > { %4073 = vmatmul.mubr.msk.bf16.vlgmr.msra.gmra.mrb[44].mxu1 %vm1529_vm1, %v2443_v45 }
 0x5d2   : > { %4083 = vmatpush3.bf16.msra.mxu1 %v4398_v44  ;;  %4084 = vmatprep.mubr.msk.bf16.mxu1 %vm4913_vm0, %v4912_v3 }
 0x5d3   : > { %4094 = vmatprep.subr.bf16.mxu1 %v4912_v3 }
 0x5d6   : > { %v2215_v48 = vpop.f32.mrb[20].mxu0 }
 0x5d7   : > { %v4032_v38 = vpop.f32.mrb[21].mxu0 }
 0x5d8   : > { %v2218_v14 = vpop.f32.mrb[22].mxu0 }
 0x5d9   : > { %v2444_v21 = vpack.c.bf16 %v2218_v14, %v2215_v48  ;;  %v4033_v54 = vpop.f32.mrb[23].mxu0 }
 0x5db   : > { %4079 = vmatmul.mubr.msk.bf16.vlgmr.msra.gmra.mrb[36].mxu0 %vm1529_vm1, %v2444_v21 }
 0x5dc   : > { %4089 = vmatpush3.bf16.msra.mxu0 %v4397_v52  ;;  %4090 = vmatprep.mubr.msk.bf16.mxu0 %vm4913_vm0, %v4912_v3 }
 0x5dd   : > { %4100 = vmatprep.subr.bf16.mxu0 %v4912_v3 }
 0x5de   : > { %v2303_v57 = vpop.f32.mrb[24].mxu0 }
 0x5df   : > { %v4044_v59 = vpop.f32.mrb[25].mxu0 }
 0x5e0   : > { %v2306_v60 = vpop.f32.mrb[26].mxu0 }
 0x5e1   : > { %v2446_v0 = vpack.c.bf16 %v2306_v60, %v2303_v57  ;;  %v4045_v1 = vpop.f32.mrb[27].mxu0 }
 0x5e2   : > { %v2259_v42 = vpop.f32.mrb[32].mxu1  ;;  %v3758_v1 = vld [vmem:[%s6291_s23] ss:$0 sm:$0xff] }
 0x5e3   : > { %v4038_v2 = vpop.f32.mrb[33].mxu1  ;;  %4091 = vmatmul.mubr.msk.bf16.vlgmr.msra.gmra.mrb[40].mxu0 %vm1529_vm1, %v2446_v0 }
 0x5e4   : > { %v2262_v46 = vpop.f32.mrb[34].mxu1  ;;  %4101 = vmatpush3.bf16.msra.mxu0 %v4400_v61  ;;  %4102 = vmatprep.mubr.msk.bf16.mxu0 %vm4913_vm0, %v4912_v3 }
 0x5e5   : > { %v2445_v4 = vpack.c.bf16 %v2262_v46, %v2259_v42  ;;  %v4039_v5 = vpop.f32.mrb[35].mxu1 }
 0x5e7   : > { %4085 = vmatmul.mubr.msk.bf16.vlgmr.msra.gmra.mrb[48].mxu1 %vm1529_vm1, %v2445_v4 }
 0x5e8   : > { %4095 = vmatpush3.bf16.msra.mxu1 %v4399_v63  ;;  %4096 = vmatprep.mubr.msk.bf16.mxu1 %vm4913_vm0, %v4912_v3 }
 0x5e9   : > { %4106 = vmatprep.subr.bf16.mxu1 %v4912_v3 }
 0x60d   : > { %v2391_v7 = vpop.f32.mrb[28].mxu0 }
 0x60e   : > { %v4056_v10 = vpop.f32.mrb[29].mxu0 }
 0x60f   : > { %v2394_v29 = vpop.f32.mrb[30].mxu0  ;;  %v4514_v10 = vld [vmem:[#allocation2] sm:$0xff] }
 0x610   : > { %v2448_v36 = vpack.c.bf16 %v2394_v29, %v2391_v7  ;;  %v4057_v28 = vpop.f32.mrb[31].mxu0 }
 0x611   : > { %v2347_v50 = vpop.f32.mrb[36].mxu1 }
 0x612   : > { %v4050_v55 = vpop.f32.mrb[37].mxu1  ;;  %4103 = vmatmul.mubr.msk.bf16.vlgmr.msra.gmra.mrb[44].mxu0 %vm1529_vm1, %v2448_v36  ;;  %v4515_v36 = vld [vmem:[#allocation2 + $0x8] sm:$0xff] }
 0x613   : > { %v2350_v41 = vpop.f32.mrb[38].mxu1  ;;  %v4404_v55 = vld [vmem:[%s5524_s28 + $0x4] ss:$8 sps:$4 sm:$0xff]  }
 0x614   : > { %v2447_v15 = vpack.c.bf16 %v2350_v41, %v2347_v50  ;;  %v4051_v9 = vpop.f32.mrb[39].mxu1  ;;  %v4402_v50 = vld [vmem:[%s5524_s28] ss:$8 sps:$4 sm:$0xff]   ;;  %v4407_v41 = vld [vmem:[%s5524_s28 + $0x14] ss:$8 sps:$4 sm:$0xff]   ;;  %3041 = vmatprep.subr.bf16.mxu0 %v4404_v55 }
 0x615   : > { %3042 = vmatpush1.bf16.msra.mxu0 %v4402_v50 }
 0x616   : > { %4097 = vmatmul.mubr.msk.bf16.vlgmr.msra.gmra.mrb[52].mxu1 %vm1529_vm1, %v2447_v15  ;;  %3043 = vmatprep.subr.bf16.mxu0 %v4407_v41 }
 0x617   : > { %4107 = vmatpush3.bf16.msra.mxu1 %v4401_v6  ;;  %4108 = vmatprep.mubr.msk.bf16.mxu1 %vm4913_vm0, %v4912_v3  ;;  %v4405_v6 = vld [vmem:[%s5524_s28 + $0x10] ss:$8 sps:$4 sm:$0xff]  }
 0x619   : > { %v2435_v16 = vpop.f32.mrb[40].mxu1  ;;  %3044 = vmatpush1.bf16.msra.mxu0 %v4405_v6 }
 0x61a   : > { %v4062_v13 = vpop.f32.mrb[41].mxu1 }
 0x61b   : > { %v2438_v19 = vpop.f32.mrb[42].mxu1 }
 0x61c   : > { %v2449_v18 = vpack.c.bf16 %v2438_v19, %v2435_v16  ;;  %v4063_v20 = vpop.f32.mrb[43].mxu1 }
 0x61e   : > { %4109 = vmatmul.mubr.msk.bf16.vlgmr.msra.gmra.mrb[56].mxu1 %vm1529_vm1, %v2449_v18 }
 0x68c   : > { %v2509_v12 = vpop.f32.mrb[32].mxu0 }
 0x68d   : > { %v4068_v22 = vpop.f32.mrb[33].mxu0 }
 0x68e   : > { %v2512_v23 = vpop.f32.mrb[34].mxu0  ;;  %v4410_v22 = vld [vmem:[%s5524_s28 + $0x24] ss:$8 sps:$4 sm:$0xff]  }
 0x68f   : > { %v4069_v17 = vpop.f32.mrb[35].mxu0  ;;  %3045 = vmatprep.subr.bf16.mxu0 %v4410_v22 }
 0x690   : > { %v4413_v17 = vld [vmem:[%s5524_s28 + $0x34] ss:$8 sps:$4 sm:$0xff]  }
 0x6a4   : > { %v2559_v26 = vpop.f32.mrb[44].mxu1 }
 0x6a5   : > { %v2866_v27 = vadd.f32 %v2559_v26, %v2509_v12  ;;  %v4074_v62 = vpop.f32.mrb[45].mxu1  ;;  %v4411_v26 = vld [vmem:[%s5524_s28 + $0x30] ss:$8 sps:$4 sm:$0xff]  }
 0x6a6   : > { %v2562_v53 = vpop.f32.mrb[46].mxu1  ;;  %v4414_v62 = vld [vmem:[%s5524_s28 + $0x40] ss:$8 sps:$4 sm:$0xff]  }
 0x6a7   : > { %v2873_v25 = vadd.f32 %v2562_v53, %v2512_v23  ;;  %v4075_v49 = vpop.f32.mrb[47].mxu1  ;;  %v4408_v23 = vld [vmem:[%s5524_s28 + $0x20] ss:$8 sps:$4 sm:$0xff]   ;;  %v4419_v53 = vld [vmem:[%s5524_s28 + $0x54] ss:$8 sps:$4 sm:$0xff]  }
 0x6a8   : > { %3046 = vmatpush1.bf16.msra.mxu0 %v4408_v23  ;;  %v4420_v49 = vld [vmem:[%s5524_s28 + $0x60] ss:$8 sps:$4 sm:$0xff]  }
 0x6a9   : > { %3047 = vmatprep.subr.bf16.mxu0 %v4413_v17 }
 0x6ac   : > { %3048 = vmatpush1.bf16.msra.mxu0 %v4411_v26 }
 0x6ae   : > { %v2609_v31 = vpop.f32.mrb[36].mxu0 }
 0x6af   : > { %v2867_v32 = vadd.f32 %v2866_v27, %v2609_v31  ;;  %v4080_v3 = vpop.f32.mrb[37].mxu0  ;;  %v4416_v27 = vld [vmem:[%s5524_s28 + $0x44] ss:$8 sps:$4 sm:$0xff]  }
 0x6b0   : > { %v2612_v58 = vpop.f32.mrb[38].mxu0  ;;  %3049 = vmatprep.subr.bf16.mxu0 %v4416_v27  ;;  %v4422_v31 = vld [vmem:[%s5524_s28 + $0x64] ss:$8 sps:$4 sm:$0xff]   ;;  %v4921_v3 = vmov 0   ;;  %v3777_v27 = vld [vmem:[%s1013_s2] ss:$0 sm:$0xff] }
 0x6b1   : > { %v2874_v8 = vadd.f32 %v2873_v25, %v2612_v58  ;;  %v4081_v33 = vpop.f32.mrb[39].mxu0  ;;  %3050 = vmatpush1.bf16.msra.mxu0 %v4414_v62  ;;  %v4417_v25 = vld [vmem:[%s5524_s28 + $0x50] ss:$8 sps:$4 sm:$0xff]   ;;  %3073 = vmatprep.mubr.bf16.mxu0 %v4921_v3 }
 0x6b2   : > { %3051 = vmatprep.subr.bf16.mxu0 %v4419_v53  ;;  %v4423_v58 = vld [vmem:[%s5524_s28 + $0x70] ss:$8 sps:$4 sm:$0xff]   ;;  %v4427_v33 = vld [vmem:[%s5526_s16] sm:$0xff]  }
 0x6b5   : > { %3052 = vmatpush1.bf16.msra.mxu0 %v4417_v25 }
 0x6b6   : > { %v2709_v51 = vpop.f32.mrb[40].mxu0  ;;  %3053 = vmatprep.subr.bf16.mxu0 %v4422_v31 }
 0x6b7   : > { %v4092_v56 = vpop.f32.mrb[41].mxu0 }
 0x6b8   : > { %v2712_v34 = vpop.f32.mrb[42].mxu0  ;;  %v4429_v56 = vld [vmem:[%s5526_s16 + $0x8] sm:$0xff]  }
 0x6b9   : > { %v4093_v35 = vpop.f32.mrb[43].mxu0  ;;  %3054 = vmatpush1.bf16.msra.mxu0 %v4420_v49 }
 0x6ba   : > { %v2659_v37 = vpop.f32.mrb[48].mxu1  ;;  %v4431_v35 = vld [vmem:[%s5526_s16 + $0x10] sm:$0xff]  }
 0x6bb   : > { %v2868_v39 = vadd.f32 %v2867_v32, %v2659_v37  ;;  %v4086_v24 = vpop.f32.mrb[49].mxu1  ;;  %v4425_v32 = vld [vmem:[%s5524_s28 + $0x74] ss:$8 sps:$4 sm:$0xff]  }
 0x6bc   : > { %v2662_v40 = vpop.f32.mrb[50].mxu1  ;;  %3055 = vmatprep.subr.bf16.mxu0 %v4425_v32  ;;  %v4432_v37 = vld [vmem:[%s5526_s16 + $0x58] sm:$0xff]   ;;  %v4434_v24 = vld [vmem:[%s5526_s16 + $0x60] sm:$0xff]  }
 0x6bd   : > { %v2875_v11 = vadd.f32 %v2874_v8, %v2662_v40  ;;  %v4087_v43 = vpop.f32.mrb[51].mxu1  ;;  %v2869_v30 = vadd.f32 %v2868_v39, %v2709_v51  ;;  %3056 = vmatpush1.bf16.msra.mxu0 %v4423_v58  ;;  %v4426_v8 = vld [vmem:[%s5526_s16 + $0x40] sm:$0xff]   ;;  %v4428_v51 = vld [vmem:[%s5526_s16 + $0x48] sm:$0xff]   ;;  %v4433_v39 = vld [vmem:[%s5526_s16 + $0x18] sm:$0xff]  }
 0x6be   : > { %3886 = vmatprep.subr.bf16.mxu1 %v4426_v8  ;;  %v4435_v40 = vld [vmem:[%s5526_s16 + $0x20] sm:$0xff]  }
 0x6bf   : > { %v2876_v44 = vadd.f32 %v2875_v11, %v2712_v34  ;;  %3887 = vmatpush3.bf16.msra.mxu1 %v4427_v33  ;;  %v4430_v34 = vld [vmem:[%s5526_s16 + $0x50] sm:$0xff]   ;;  %v4436_v11 = vld [vmem:[%s5526_s16 + $0x68] sm:$0xff]  }
 0x6c0   : > { %3888 = vmatprep.subr.bf16.mxu1 %v4428_v51 }
 0x6c3   : > { %3889 = vmatpush3.bf16.msra.mxu1 %v4429_v56 }
 0x6c4   : > { %3890 = vmatprep.subr.bf16.mxu1 %v4430_v34 }
 0x6c7   : > { %3891 = vmatpush3.bf16.msra.mxu1 %v4431_v35 }
 0x6c8   : > { %3892 = vmatprep.subr.bf16.mxu1 %v4432_v37 }
 0x6cb   : > { %3893 = vmatpush3.bf16.msra.mxu1 %v4433_v39 }
 0x6cc   : > { %3894 = vmatprep.subr.bf16.mxu1 %v4434_v24 }
 0x6cf   : > { %3895 = vmatpush3.bf16.msra.mxu1 %v4435_v40 }
 0x6d0   : > { %3896 = vmatprep.subr.bf16.mxu1 %v4436_v11 }
 0x6e5   : > { %v2809_v45 = vpop.f32.mrb[44].mxu0 }
 0x6e6   : > { %v4104_v47 = vpop.f32.mrb[45].mxu0 }
 0x6e7   : > { %v2812_v48 = vpop.f32.mrb[46].mxu0 }
 0x6e8   : > { %v4105_v38 = vpop.f32.mrb[47].mxu0 }
 0x6e9   : > { %v2759_v14 = vpop.f32.mrb[52].mxu1 }
 0x6ea   : > { %v2870_v52 = vadd.f32 %v2869_v30, %v2759_v14  ;;  %v4098_v21 = vpop.f32.mrb[53].mxu1  ;;  %v3759_v14 = vld [vmem:[%s6293_s0] ss:$0 sm:$0xff] }
 0x6eb   : > { %v2762_v54 = vpop.f32.mrb[54].mxu1 }
 0x6ec   : > { %v2877_v57 = vadd.f32 %v2876_v44, %v2762_v54  ;;  %v4099_v59 = vpop.f32.mrb[55].mxu1  ;;  %v2871_v60 = vadd.f32 %v2870_v52, %v2809_v45 }
 0x6ed   : > { %v3760_v59 = vld [vmem:[%s1006_s30] ss:$0 sm:$0xff] }
 0x6ee   : > { %v2878_v61 = vadd.f32 %v2877_v57, %v2812_v48 }
 0x6f1   : > { %v2859_v0 = vpop.f32.mrb[56].mxu1 }
 0x6f2   : > { %v2872_v42 = vadd.f32 %v2871_v60, %v2859_v0  ;;  %v4110_v2 = vpop.f32.mrb[57].mxu1 }
 0x6f3   : > { %v2862_v46 = vpop.f32.mrb[58].mxu1  ;;  %v4438_v2 = vld [vmem:[%s5526_s16 + $0x70] sm:$0xff]  }
 0x6f4   : > { %v2887_v63 = vadd.f32 %v3758_v1, %v2872_v42  ;;  %v2879_v4 = vadd.f32 %v2878_v61, %v2862_v46  ;;  %v4111_v5 = vpop.f32.mrb[59].mxu1  ;;  %v4437_v42 = vld [vmem:[%s5526_s16 + $0x28] sm:$0xff]   ;;  %v4439_v46 = vld [vmem:[%s5526_s16 + $0x30] sm:$0xff]  }
 0x6f5   : > { %3897 = vmatpush3.bf16.msra.mxu1 %v4437_v42  ;;  %v2951_v5 = vlaneseq }
 0x6f6   : > { %v2888_v7 = vadd.f32 %v3758_v1, %v2879_v4  ;;  %v2889_v29 = vadd.f32 %v4514_v10, %v2887_v63  ;;  %3898 = vmatprep.subr.bf16.mxu1 %v4438_v2  ;;  %v4440_v63 = vld [vmem:[%s5526_s16 + $0x78] sm:$0xff]  }
 0x6f7   : > { %v4441_v4 = vld [vmem:[%s5526_s16 + $0x38] sm:$0xff]  }
 0x6f8   : > { %2891 = vadd.xlane.f32.xlu1 %v2889_v29  ;;  %v2890_v28 = vadd.f32 %v4515_v36, %v2888_v7  ;;  %v2952_v7 = vshrl.u32 %v2951_v5, 7 }
 0x6f9   : > { %3899 = vmatpush3.bf16.msra.mxu1 %v4439_v46 }
 0x6fa   : > { %2893 = vadd.xlane.f32.xlu0 %v2890_v28  ;;  %3900 = vmatprep.subr.bf16.mxu1 %v4440_v63  ;;  %v2953_v10 = vsub.s32 0, %v2952_v7  ;;  %v2957_v36 = vsub.s32 1, %v2952_v7 }
 0x6fd   : > { %3901 = vmatpush3.bf16.msra.mxu1 %v4441_v4 }
 0x785   : > { %v2892_v15 = vpop.xlane.xlu1 %2891 }
 0x786   : > { %v2896_v9 = vmul.f32 0.0078125, %v2892_v15 }
 0x787   : > { %v2894_v16 = vpop.xlane.xlu0 %2893 }
 0x788   : > { %v5978_v13 = vsub.f32 %v2889_v29, %v2896_v9  ;;  %v2897_v19 = vmul.f32 0.0078125, %v2894_v16  ;;  %v2949_v29 = vld [vmem:[%s5568_s26] sm:$0x3] }
 0x789   : > { %v2958_v50 = vrot.slane %v2949_v29, %v2957_v36 }
 0x78a   : > { %v5980_v18 = vsub.f32 %v2890_v28, %v2897_v19  ;;  %v2900_v20 = vmul.f32 %v5978_v13, %v5978_v13  ;;  %v2954_v28 = vrot.slane %v2949_v29, %v2953_v10 }
 0x78c   : > { %2902 = vadd.xlane.f32.xlu0 %v2900_v20  ;;  %v2901_v12 = vmul.f32 %v5980_v18, %v5980_v18 }
 0x78e   : > { %2904 = vadd.xlane.f32.xlu1 %v2901_v12 }
 0x819   : > { %v2903_v43 = vpop.xlane.xlu0 %2902 }
 0x81a   : > { %v2906_v30 = vmul.f32 0.0078125, %v2903_v43 }
 0x81b   : > { %v2905_v44 = vpop.xlane.xlu1 %2904 }
 0x81c   : > { %v2908_v45 = vadd.f32 1e-05, %v2906_v30  ;;  %v2907_v47 = vmul.f32 0.0078125, %v2905_v44 }
 0x81e   : > { %4506 = vrsqrt.f32 %v2908_v45  ;;  %v2909_v48 = vadd.f32 1e-05, %v2907_v47 }
 0x820   : > { %4508 = vrsqrt.f32 %v2909_v48  ;;  %v3794_v48 = vld [vmem:[%s1016_s3] ss:$0 sm:$0xff] }
 0x828   : > { %v4507_v38 = vpop.eup %4506 }
 0x829   : > { %v2912_v52 = vmul.f32 %v4507_v38, %v5978_v13 }
 0x82a   : > { %v4509_v21 = vpop.eup %4508 }
 0x82b   : > { %v2913_v54 = vmul.f32 %v4509_v21, %v5980_v18  ;;  %v2921_v57 = vmul.f32 %v3759_v14, %v2912_v52  ;;  %v3795_v52 = vld [vmem:[%s1019_s14] ss:$0 sm:$0xff] }
 0x82d   : > { %v2922_v60 = vmul.f32 %v3759_v14, %v2913_v54  ;;  %v2930_v61 = vadd.f32 %v3760_v59, %v2921_v57 }
 0x82f   : > { %v2931_v0 = vadd.f32 %v3760_v59, %v2922_v60 }
 0x831   : > { %v2932_v1 = vpack.c.bf16 %v2931_v0, %v2930_v61 }
 0x833   : > { %3074 = vmatmul.mubr.bf16.vlgmr.msra.gmra.mrb[48].mxu0 %v2932_v1 }
 0x906   : > { %v3075_v55 = vpop.f32.mrb[48].mxu0 }
 0x907   : > { %v3076_v41 = vadd.f32 %v3075_v55, %v2954_v28  ;;  %v3077_v6 = vpop.f32.mrb[49].mxu0 }
 0x908   : > { %v3078_v15 = vadd.f32 %v3077_v6, %v2958_v50  ;;  %v3079_v9 = vpop.f32.mrb[50].mxu0 }
 0x909   : > { %v3080_v16 = vadd.f32 %v3079_v9, %v2954_v28  ;;  %v3081_v13 = vpop.f32.mrb[51].mxu0  ;;  %v3084_v18 = vmax.f32 %v3076_v41, 0.0 }
 0x90a   : > { %v3082_v19 = vadd.f32 %v3081_v13, %v2958_v50  ;;  %v3085_v12 = vmax.f32 %v3078_v15, 0.0 }
 0x90b   : > { %v3086_v20 = vmax.f32 %v3080_v16, 0.0 }
 0x90c   : > { %v3087_v22 = vmax.f32 %v3082_v19, 0.0 }
 0x90d   : > { %v3088_v23 = vpack.c.bf16 %v3086_v20, %v3084_v18 }
 0x90e   : > { %v3089_v17 = vpack.c.bf16 %v3087_v22, %v3085_v12 }
 0x910   : > { %3257 = vmatprep.mubr.bf16.mxu1 %v3089_v17 }
 0x911   : > { %3258 = vmatmul.mubr.bf16.vlgmr.msra.gmra.mrb[60].mxu1 %v3088_v23 }
 0x9e4   : > { %v3902_v26 = vpop.f32.mrb[60].mxu1 }
 0x9e5   : > { %v3903_v62 = vpop.f32.mrb[61].mxu1 }
 0x9e6   : > { %v3904_v53 = vadd.f32 %v3903_v62, %v3902_v26  ;;  %v3905_v25 = vpop.f32.mrb[62].mxu1 }
 0x9e7   : > { %v3906_v49 = vpop.f32.mrb[63].mxu1 }
 0x9e8   : > { %v3260_v31 = vadd.f32 %v3904_v53, %v3777_v27  ;;  %v3907_v32 = vadd.f32 %v3906_v49, %v3905_v25 }
 0x9ea   : > { %v3263_v3 = vadd.f32 %v3907_v32, %v3777_v27  ;;  %v3266_v58 = vadd.f32 %v3260_v31, %v2930_v61 }
 0x9ec   : > { %3268 = vadd.xlane.f32.xlu0 %v3266_v58  ;;  %v3267_v8 = vadd.f32 %v3263_v3, %v2931_v0 }
 0x9ee   : > { %3270 = vadd.xlane.f32.xlu1 %v3267_v8 }
 0xa79   : > { %v3269_v33 = vpop.xlane.xlu0 %3268 }
 0xa7a   : > { %v3272_v51 = vmul.f32 0.0078125, %v3269_v33 }
 0xa7b   : > { %v3271_v56 = vpop.xlane.xlu1 %3270 }
 0xa7c   : > { %v3274_v34 = vsub.f32 %v3266_v58, %v3272_v51  ;;  %v3273_v35 = vmul.f32 0.0078125, %v3271_v56 }
 0xa7e   : > { %v3275_v37 = vsub.f32 %v3267_v8, %v3273_v35  ;;  %v3276_v39 = vmul.f32 %v3274_v34, %v3274_v34 }
 0xa80   : > { %3278 = vadd.xlane.f32.xlu0 %v3276_v39  ;;  %v3277_v24 = vmul.f32 %v3275_v37, %v3275_v37 }
 0xa82   : > { %3280 = vadd.xlane.f32.xlu1 %v3277_v24 }
 0xb0d   : > { %v3279_v40 = vpop.xlane.xlu0 %3278 }
 0xb0e   : > { %v3282_v11 = vmul.f32 0.0078125, %v3279_v40 }
 0xb0f   : > { %v3281_v43 = vpop.xlane.xlu1 %3280 }
 0xb10   : > { %v3284_v30 = vadd.f32 1e-05, %v3282_v11  ;;  %v3283_v44 = vmul.f32 0.0078125, %v3281_v43 }
 0xb12   : > { %4510 = vrsqrt.f32 %v3284_v30  ;;  %v3285_v45 = vadd.f32 1e-05, %v3283_v44 }
 0xb14   : > { %4512 = vrsqrt.f32 %v3285_v45 }
 0xb1c   : > { %v4511_v47 = vpop.eup %4510 }
 0xb1d   : > { %v3288_v38 = vmul.f32 %v4511_v47, %v3274_v34 }
 0xb1e   : > { %v4513_v14 = vpop.eup %4512 }
 0xb1f   : > { %v3297_v21 = vmul.f32 %v3794_v48, %v3288_v38  ;;  %v3289_v54 = vmul.f32 %v4513_v14, %v3275_v37  ;;  %3313 = sbr.rel (%p3796_p8) target bundleno = 2854 (0xb26), region = 132 }
 0xb21   : > { %v3306_v57 = vadd.f32 %v3795_v52, %v3297_v21  ;;  %v3298_v59 = vmul.f32 %v3794_v48, %v3289_v54 }
 0xb23   : > { %3308 = vst [vmem:[#allocation2] sm:$0xff] %v3306_v57  ;;  %v3307_v60 = vadd.f32 %v3795_v52, %v3298_v59  ;;  %3314 = vst [vmem:[%s5579_s21] sm:$0xff] (!%p3796_p8), %v3306_v57 }
 0xb25   : > { %3309 = vst [vmem:[#allocation2 + $0x8] sm:$0xff] %v3307_v60  ;;  %3315 = vst [vmem:[%s5579_s21 + $0x8] sm:$0xff] (!%p3796_p8), %v3307_v60 }
 0xb26 PF: > { %s6299_s3 = sld [smem:[#allocation31_spill]]  ;;  %s6301_s15 = sld [smem:[#allocation37_spill]] }
 0xb27   : > { %s6300_s10 = sld [smem:[#allocation45_spill]]  ;;  %s6302_s5 = sld [smem:[#allocation64_spill]] }
 0xb28   : > { %s3330_s22 = sshll.u32 %s5579_s21, 4  ;;  %s4922_s11 = smov [#allocation17]   ;;  %s6052_s22 = int_to_ptr.vmem [resolvable:$true] %s3330_s22 }
 0xb29   : > { %s4756_s13 = scalar_lea.vmem %s6052_s22, 256  ;;  %s4760_s23 = sshll.u32 %s4922_s11, 4  ;;  %s4761_s23 = int_to_ptr.vmem [resolvable:$false] %s4760_s23 }
 0xb2a   : > { %p4757_p1 = scmp.ne.s32.totalorder %s6052_s22, %s4756_s13  ;;  %s4762_s28 = scalar_lea.vmem %s4761_s23, 512 }
 0xb2b   : > { %p4763_p2 = scmp.lt.s32.totalorder %s6052_s22, %s4761_s23  ;;  %p4764_p12 = scmp.lt.s32.totalorder %s4762_s28, %s4756_s13 }
 0xb2c   : > { %s3810_s14 = sshll.u32 %s6299_s3, 8  ;;  %p6303_p10 = scmp.ne.s32.totalorder %s6301_s15, 0 }
 0xb2d   : > { %s6049_s19 = scalar_lea.hbm %s6302_s5, %s3810_s14  ;;  %s3317_s29 = scalar_lea.sflag [#allocation5], %s6300_s10 }
 0xb2e   : > { %p4758_p7 = pnand %p4757_p1, %p6303_p10  ;;  %p4765_p5 = por %p4764_p12, %p4763_p2 }
 0xb30   : > { %p4759_p3 = pneg %p4758_p7 }
 0xb32   : > { %p4766_p11 = pnand %p4765_p5, %p4759_p3 }
 0xb34   : > { %4769 = shalt.err (!%p4766_p11)
}
 0xb35   : > { %s4770_s21 = scalar_lea.hbm %s6049_s19, 256  ;;  %s4774_s0 = scalar_lea.hbm %s6302_s5, 512 }
 0xb36   : > { %p4771_p13 = scmp.ne.s32.totalorder %s6049_s19, %s4770_s21  ;;  %p4775_p9 = scmp.lt.u32.totalorder %s6049_s19, %s6302_s5 }
 0xb37   : > { %p4776_p0 = scmp.lt.u32.totalorder %s4774_s0, %s4770_s21  ;;  %p4778_p1 = scmp.lt.u32.totalorder %s4770_s21, %s6049_s19 }
 0xb38   : > { %p4772_p4 = pnand %p4771_p13, %p6303_p10 }
 0xb39   : > { %p4777_p8 = por %p4776_p0, %p4775_p9 }
 0xb3a   : > { %p4773_p6 = pneg %p4772_p4 }
 0xb3b   : > { %p4779_p7 = por %p4778_p1, %p4777_p8 }
 0xb3d   : > { %p4780_p3 = pnand %p4779_p7, %p4773_p6 }
 0xb3f   : > { %4783 = shalt.err (!%p4780_p3)
}
 0xb40   : > { %s4923_s20 = smov 128   ;;  %s4924_s16 = smov 8  }
 0xb41   : > { %4128 = dma.vmem_to_hbm [thread:$0]  (%p6303_p10), %s6052_s22, 256, %s6049_s19, %s3317_s29, %s4923_s20, %s4923_s20, %s4924_s16  }
 0xb42 PF: > { %s6304_s30 = sld [smem:[#allocation34_spill]]  ;;  %s6305_s26 = sld [smem:[#allocation27_spill]] }
 0xb43   : > { %s6306_s2 = sld [smem:[#allocation38_spill]] }
 0xb48   : > { %p4160_p2 = scmp.ge.s32.totalorder %s6304_s30, 2  ;;  %s3345_s27 = sand.u32 1, %s6305_s26  }
 0xb49   : > { %p6307_p12 = scmp.ne.s32.totalorder %s6306_s2, 0  ;;  %s3346_s18 = scalar_lea.sflag [#allocation5], %s3345_s27 }
 0xb4b   : > { %p4156_p5 = pnand %p4160_p2, %p6307_p12 }
 0xb4d   : > { %4853 = dma.done.wait (!%p4156_p5), %s3346_s18, 256  }
 0xb4e   : > { %4855 = vsyncadd (!%p4156_p5), %s3346_s18, 4294967040  ;;  %s46_s2 = sadd.s32 1, %s6304_s30   ;;  %s6308_s27 = sld [smem:[#allocation25_spill]] }
 0xb4f   : > { %p43_p11 = scmp.ge.s32.totalorder %s46_s2, 6   ;;  %s6309_s28 = sld [smem:[#allocation26_spill]] }
 0xb50   : > { %s6310_s29 = sld [smem:[#allocation43_spill]]  ;;  %s6311_s30 = sld [smem:[#allocation28_spill]] }
 0xb51   : > { %s6312_s0 = sld [smem:[#allocation29_spill]]  ;;  %s6313_s19 = sld [smem:[#allocation44_spill]] }
 0xb52   : > { %s6314_s1 = sld [smem:[#allocation32_spill]]  ;;  %s6315_s20 = sld [smem:[#allocation33_spill]] }
 0xb53   : > { %s6316_s21 = sld [smem:[#allocation40_spill]]  ;;  %s6317_s22 = sld [smem:[#allocation42_spill]] }
 0xb54   :  { %45 = sbr.rel (!%p43_p11) target bundleno = 37 (0x25), region = 260 }
 0xb5b   :  { %3351 = vsyncpa [#allocation4], 1 }
 0xb5c   :  { %3353 = vsyncpa [#allocation4 + $0x1], 1 }
 0xb5d   :  { %3354 = vsyncpa [#allocation7], 1 }
 0xb5e   :  { %3356 = vsyncpa [#allocation7 + $0x1], 1 }
 0xb5f   :  { %3357 = vsyncpa [#allocation10], 1 }
 0xb60   :  { %3359 = vsyncpa [#allocation10 + $0x1], 1 }
 0xb61   :  { %3360 = vsyncpa [#allocation13], 1 }
 0xb62   :  { %3362 = vsyncpa [#allocation13 + $0x1], 1 }
 0xb63   :  { %3363 = vsyncpa [#allocation16], 1 }
 0xb64   :  { %3365 = vsyncpa [#allocation16 + $0x1], 1 }
 0xb65   :  { %3366 = vsyncpa [#allocation5], 1 }
 0xb66   :  { %3368 = vsyncpa [#allocation5 + $0x1], 1 }

</bundles_post_ra>
